<compile_context>
chip_gen: v5e
topology: v5e:2x2
jax: 0.10.0
libtpu: 0.0.40
codegen_flags: <defaults>
</compile_context>

<pallas_src>
from functools import partial

import jax
import jax.numpy as jnp
from jax.experimental import pallas as pl
from jax.experimental.pallas import tpu as pltpu


# ---- per-tile statistics layout: (STAT_ROWS, d4_p) rows per grid step ----
# For each of the 4 (input, estimator) calls k = 0..3, rows 5k..5k+4 hold
#   A_k[d] = sum_i (mu-y)^2 * exp(-lv)      B_k[d] = sum_i lv
#   C_k[d] = sum_i exp(-lv)                 D_k[d] = sum_i mu * exp(-lv)
#   E_k[d] = sum_i mu^2 * exp(-lv)
# row 20 = sum_i z2 ; row 21 = sum_i z2^2 ; rows 22..23 = zero padding.
ROWS_PER_CALL = 5
SY_ROW = 20
SY2_ROW = 21
STAT_ROWS = 24


def _pad128(n):
    return ((n + 127) // 128) * 128


def _fcnet_mi_kernel(
    x_ref,
    wa_ref, ba_ref,      # [fc1 | c1_mu1 | c1_lv1]
    wb_ref, bb_ref,      # [fc2 | c2_mu1 | c2_lv1]
    w3_ref, b3_ref,      # fc3
    wc_ref, bc_ref,      # [fc4 | c2_mu1 | c2_lv1]
    wd_ref, bd_ref,      # [c1_mu1 | c1_lv1]
    we1_ref, be1_ref,    # block-diag [c1_mu2 ; c1_lv2]
    we2_ref, be2_ref,    # block-diag [c2_mu2 ; c2_lv2]
    z4_ref, stats_ref,
    *, dim_p, d2_p, d4_p,
):
    f32 = jnp.float32
    bf16 = jnp.bfloat16

    def mm(h_bf16, w_ref, b_ref):
        # bf16 MXU matmul with f32 accumulation; bias add in f32.
        return jnp.dot(h_bf16, w_ref[...], preferred_element_type=f32) + b_ref[...]

    # ---- trunk + CLUB first layers, shared-LHS column fusion ----
    x = x_ref[...]                                            # bf16 (cast in wrapper)

    m1 = mm(x, wa_ref, ba_ref)                                # (tb, 3*d2_p)
    z1 = jnp.maximum(m1[:, :d2_p], 0.0)
    h1x = jnp.maximum(m1[:, d2_p:], 0.0).astype(bf16)         # CLUB1(x) hidden [mu|lv]

    z1b = z1.astype(bf16)
    m2 = mm(z1b, wb_ref, bb_ref)                              # (tb, 3*d4_p)
    z2 = m2[:, :d4_p]                                         # f32 "y" for all CLUB stats
    h2z1 = jnp.maximum(m2[:, d4_p:], 0.0).astype(bf16)        # CLUB2(z1) hidden [mu|lv]

    z2b = z2.astype(bf16)
    z3 = mm(z2b, w3_ref, b3_ref)                              # (tb, d2_p)
    z3b = z3.astype(bf16)

    m4 = mm(z3b, wc_ref, bc_ref)                              # (tb, dim_p + 2*d4_p)
    z4 = m4[:, :dim_p]
    h2z3 = jnp.maximum(m4[:, dim_p:], 0.0).astype(bf16)       # CLUB2(z3) hidden [mu|lv]

    z4_ref[...] = z4.astype(z4_ref.dtype)
    z4b = z4.astype(bf16)

    m5 = mm(z4b, wd_ref, bd_ref)                              # (tb, 2*d2_p)
    h1z4 = jnp.maximum(m5, 0.0).astype(bf16)                  # CLUB1(z4) hidden [mu|lv]

    # ---- CLUB second layers: one block-diagonal full-width matmul per call ----
    def mu_logvar(h_bf16, w2_ref, b2_ref):
        o = mm(h_bf16, w2_ref, b2_ref)                        # (tb, 2*d4_p): [mu | lv_pre]
        return o[:, :d4_p], jnp.tanh(o[:, d4_p:])

    # ---- per-tile sufficient statistics (sublane reductions, direct row stores) ----
    y = z2

    def store_stats(k, mu, lv):
        iv = jnp.exp(-lv)
        diff = mu - y
        base = ROWS_PER_CALL * k
        stats_ref[base + 0, :] = jnp.sum(diff * diff * iv, axis=0)   # A
        stats_ref[base + 1, :] = jnp.sum(lv, axis=0)                 # B
        # C is `tile_rows` (not 0) in padded columns (exp(-0)=1); harmless only
        # because the wrapper multiplies C by y2_mean, which is 0 there.
        stats_ref[base + 2, :] = jnp.sum(iv, axis=0)                 # C
        stats_ref[base + 3, :] = jnp.sum(mu * iv, axis=0)            # D
        stats_ref[base + 4, :] = jnp.sum(mu * mu * iv, axis=0)       # E

    mu, lv = mu_logvar(h1x, we1_ref, be1_ref)
    store_stats(0, mu, lv)                                    # (x , CLUB1)
    mu, lv = mu_logvar(h2z1, we2_ref, be2_ref)
    store_stats(1, mu, lv)                                    # (z1, CLUB2)
    mu, lv = mu_logvar(h2z3, we2_ref, be2_ref)
    store_stats(2, mu, lv)                                    # (z3, CLUB2)
    mu, lv = mu_logvar(h1z4, we1_ref, be1_ref)
    store_stats(3, mu, lv)                                    # (z4, CLUB1)

    stats_ref[SY_ROW, :] = jnp.sum(y, axis=0)
    stats_ref[SY2_ROW, :] = jnp.sum(y * y, axis=0)
    stats_ref[pl.ds(SY2_ROW + 1, STAT_ROWS - SY2_ROW - 1), :] = jnp.zeros(
        (STAT_ROWS - SY2_ROW - 1, d4_p), f32)


def init_params(key, dim):
    """Deterministic parameter init.  Linear weights (in, out), biases (1, out)."""
    d2, d4 = dim // 2, dim // 4

    def lin(k, din, dout):
        kw, kb = jax.random.split(k)
        scale = 1.0 / jnp.sqrt(din)
        w = jax.random.uniform(kw, (din, dout), jnp.float32, -scale, scale)
        b = jax.random.uniform(kb, (1, dout), jnp.float32, -scale, scale)
        return w, b

    keys = jax.random.split(key, 16)
    p = {}
    p["fc1"] = lin(keys[0], dim, d2)
    p["fc2"] = lin(keys[1], d2, d4)
    p["fc3"] = lin(keys[2], d4, d2)
    p["fc4"] = lin(keys[3], d2, dim)
    # fc_out / compress_rate exist in __init__ but are unused in forward().
    p["c1_mu1"] = lin(keys[4], dim, d2)
    p["c1_mu2"] = lin(keys[5], d2, d4)
    p["c1_lv1"] = lin(keys[6], dim, d2)
    p["c1_lv2"] = lin(keys[7], d2, d4)
    p["c2_mu1"] = lin(keys[8], d2, d4)
    p["c2_mu2"] = lin(keys[9], d4, d4)
    p["c2_lv1"] = lin(keys[10], d2, d4)
    p["c2_lv2"] = lin(keys[11], d4, d4)
    return p


def _pick_batch_tile(B, dim_p, d2_p, d4_p, target=1024, act_budget=24 << 20):
    """Large tiles to amortize per-step overhead (v5e/v6e); even grid-step count
    so both v7x TensorCores get work; bounded by a VMEM working-set estimate."""
    # rough per-row f32/bf16 working set of one grid step (activations + I/O blocks)
    per_row = 4 * (2 * dim_p + 2 * (3 * d2_p) + 2 * (3 * d4_p) + (dim_p + 2 * d4_p)
                   + 2 * d2_p + 4 * (2 * d4_p)) + 6 * dim_p
    cap = max(8, (act_budget // max(per_row, 1)) // 8 * 8)
    target = min(target, cap)
    if B <= 8 or B % 8 != 0:
        return B
    divs = [t for t in range(8, min(B, target) + 1, 8) if B % t == 0]
    if not divs:
        return B
    even = [t for t in divs if (B // t) % 2 == 0]   # >=2 grid steps, multiple of 2
    return max(even) if even else max(divs)


def _vmem_budget(args, tb, dim_p, d2_p, d4_p):
    """Computed VMEM limit: weights (double-buffered by the pipeline) + I/O blocks
    + activation working set + margin, clamped to <=40 MiB for v7x's 64 MiB VMEM."""
    param_bytes = 2 * sum(int(a.size) * a.dtype.itemsize for a in args[1:])
    io_bytes = 2 * (tb * dim_p * 2 + tb * dim_p * 4 + STAT_ROWS * d4_p * 4)
    act_cols = (3 * d2_p) + (3 * d4_p) + d2_p + (dim_p + 2 * d4_p) + (2 * d2_p) \
        + 4 * (2 * d4_p)
    act_bytes = tb * act_cols * 6                     # f32 values + bf16 copies, rough
    need = param_bytes + io_bytes + act_bytes + (4 << 20)
    return int(min(max(need, 16 << 20), 40 << 20))


def _prep_inputs(x, params, dim):
    d2, d4 = dim // 2, dim // 4
    dim_p, d2_p, d4_p = _pad128(dim), _pad128(d2), _pad128(d4)
    bf16 = jnp.bfloat16

    def pw(wb, in_p, out_p):
        w, b = wb
        w = jnp.pad(w, ((0, in_p - w.shape[0]), (0, out_p - w.shape[1]))).astype(bf16)
        b = jnp.pad(b, ((0, 0), (0, out_p - b.shape[1]))).astype(jnp.float32)
        return w, b

    def hcat(*wbs):
        ws, bs = zip(*wbs)
        return jnp.concatenate(ws, axis=1), jnp.concatenate(bs, axis=1)

    def blockdiag(wb_mu, wb_lv):
        (wm, bm), (wv, bv) = wb_mu, wb_lv
        top = jnp.concatenate([wm, jnp.zeros((wm.shape[0], wv.shape[1]), bf16)], axis=1)
        bot = jnp.concatenate([jnp.zeros((wv.shape[0], wm.shape[1]), bf16), wv], axis=1)
        return jnp.concatenate([top, bot], axis=0), jnp.concatenate([bm, bv], axis=1)

    fc1 = pw(params["fc1"], dim_p, d2_p)
    fc2 = pw(params["fc2"], d2_p, d4_p)
    fc3 = pw(params["fc3"], d4_p, d2_p)
    fc4 = pw(params["fc4"], d2_p, dim_p)
    c1m1 = pw(params["c1_mu1"], dim_p, d2_p)
    c1v1 = pw(params["c1_lv1"], dim_p, d2_p)
    c1m2 = pw(params["c1_mu2"], d2_p, d4_p)
    c1v2 = pw(params["c1_lv2"], d2_p, d4_p)
    c2m1 = pw(params["c2_mu1"], d2_p, d4_p)
    c2v1 = pw(params["c2_lv1"], d2_p, d4_p)
    c2m2 = pw(params["c2_mu2"], d4_p, d4_p)
    c2v2 = pw(params["c2_lv2"], d4_p, d4_p)

    wa, ba = hcat(fc1, c1m1, c1v1)        # (dim_p, 3*d2_p)
    wb_, bb_ = hcat(fc2, c2m1, c2v1)      # (d2_p, 3*d4_p)
    wc, bc = hcat(fc4, c2m1, c2v1)        # (d2_p, dim_p + 2*d4_p)
    wd, bd = hcat(c1m1, c1v1)             # (dim_p, 2*d2_p)
    we1, be1 = blockdiag(c1m2, c1v2)      # (2*d2_p, 2*d4_p)
    we2, be2 = blockdiag(c2m2, c2v2)      # (2*d4_p, 2*d4_p)

    # bf16 input block -> halves the x HBM->VMEM DMA per tile.
    x_p = jnp.pad(x, ((0, 0), (0, dim_p - dim))).astype(bf16)

    args = [x_p, wa, ba, wb_, bb_, fc3[0], fc3[1], wc, bc, wd, bd,
            we1, be1, we2, be2]
    return args, (dim_p, d2_p, d4_p)


def fcnet_with_mi(x, params, tb=None):
    B, dim = x.shape
    assert dim % 4 == 0
    args, (dim_p, d2_p, d4_p) = _prep_inputs(x, params, dim)
    if tb is None:
        tb = _pick_batch_tile(B, dim_p, d2_p, d4_p)
    assert B % tb == 0 and (tb % 8 == 0 or tb == B)
    nt = B // tb

    x_spec = pl.BlockSpec((tb, dim_p), lambda i: (i, 0))
    # Weights/biases: full block, constant block index -> stay VMEM-resident.
    # TODO(synk): pipeline_mode=pl.Buffered(1) on these grid-invariant specs would
    # save one VMEM buffer each (matters only for large dim on v7x's 64 MiB VMEM).
    param_specs = [pl.BlockSpec(a.shape, lambda i: (0, 0)) for a in args[1:]]

    z4_p, stats = pl.pallas_call(
        partial(_fcnet_mi_kernel, dim_p=dim_p, d2_p=d2_p, d4_p=d4_p),
        out_shape=(
            jax.ShapeDtypeStruct((B, dim_p), jnp.float32),
            jax.ShapeDtypeStruct((nt * STAT_ROWS, d4_p), jnp.float32),
        ),
        grid_spec=pltpu.PrefetchScalarGridSpec(
            num_scalar_prefetch=0,
            grid=(nt,),
            in_specs=[x_spec] + param_specs,
            out_specs=(
                pl.BlockSpec((tb, dim_p), lambda i: (i, 0)),
                pl.BlockSpec((STAT_ROWS, d4_p), lambda i: (i, 0)),
            ),
        ),
        compiler_params=pltpu.CompilerParams(
            dimension_semantics=("parallel",),
            vmem_limit_bytes=_vmem_budget(args, tb, dim_p, d2_p, d4_p),
        ),
    )(*args)

    # ---- exact cross-tile CLUB reduction (full-batch mean of z2, as in PyTorch) ----
    tot = jnp.sum(stats.reshape(nt, STAT_ROWS, d4_p), axis=0)   # (STAT_ROWS, d4_p)
    n = jnp.float32(B)
    y_mean = tot[SY_ROW] / n
    y2_mean = tot[SY2_ROW] / n
    mi, ll = [], []
    for k in range(4):
        A = jnp.sum(tot[ROWS_PER_CALL * k + 0])
        Bk = jnp.sum(tot[ROWS_PER_CALL * k + 1])
        C = tot[ROWS_PER_CALL * k + 2]        # only ever used multiplied by y2_mean
        D = tot[ROWS_PER_CALL * k + 3]
        E = jnp.sum(tot[ROWS_PER_CALL * k + 4])
        pos = -0.5 * A
        neg = -0.5 * (jnp.sum(y2_mean * C) - 2.0 * jnp.sum(y_mean * D) + E)
        mi.append((pos - neg) / n)
        ll.append((A + Bk) / n)
    loss1 = mi[0] + mi[1] - mi[2] - mi[3]
    loss2 = ll[0] + ll[1] + ll[2] + ll[3]
    return z4_p[:, :dim], loss1, loss2


def reference(x, params):
    """Pure-JAX reference mirroring the PyTorch semantics (full NxNxD negative
    term) with the same bf16-input / f32-accumulate matmul precision."""
    def mm(a, w):
        return jnp.dot(a.astype(jnp.bfloat16), w.astype(jnp.bfloat16),
                       preferred_element_type=jnp.float32)

    def lin(h, wb):
        w, b = wb
        return mm(h, w) + b

    def mu_logvar(h, pre):
        mu = lin(jax.nn.relu(lin(h, params[pre + "_mu1"])), params[pre + "_mu2"])
        lv = jnp.tanh(lin(jax.nn.relu(lin(h, params[pre + "_lv1"])), params[pre + "_lv2"]))
        return mu, lv

    def club_fwd(h, y, pre):
        mu, lv = mu_logvar(h, pre)
        pos = -((mu - y) ** 2) / 2.0 / jnp.exp(lv)
        neg = -((y[None, :, :] - mu[:, None, :]) ** 2).mean(axis=1) / 2.0 / jnp.exp(lv)
        return (pos.sum(-1) - neg.sum(-1)).mean()

    def club_ll(h, y, pre):
        mu, lv = mu_logvar(h, pre)
        return -((-((mu - y) ** 2) / jnp.exp(lv) - lv).sum(-1).mean())

    z1 = jax.nn.relu(lin(x, params["fc1"]))
    z2 = lin(z1, params["fc2"])
    z3 = lin(z2, params["fc3"])
    z4 = lin(z3, params["fc4"])
    loss1 = (club_fwd(x, z2, "c1") + club_fwd(z1, z2, "c2")
             - club_fwd(z3, z2, "c2") - club_fwd(z4, z2, "c1"))
    loss2 = (club_ll(x, z2, "c1") + club_ll(z1, z2, "c2")
             + club_ll(z3, z2, "c2") + club_ll(z4, z2, "c1"))
    return z4, loss1, loss2


if __name__ == "__main__":
    dim = 32      # module default is 256; small test shape, divisible by 4
    batch = 16    # tile picker -> tb=8, nt=2 -> exercises grid + cross-tile reduction

    key = jax.random.PRNGKey(0)
    kx, kp = jax.random.split(key)
    x = jax.random.normal(kx, (batch, dim), jnp.float32)
    params = init_params(kp, dim)

    fwd = jax.jit(fcnet_with_mi, static_argnames=("tb",))
    z4, loss1, loss2 = fwd(x, params)
    jax.block_until_ready((z4, loss1, loss2))

    # sanity check against pure-JAX reference (same matmul precision)
    z4_r, loss1_r, loss2_r = reference(x, params)
    assert z4.shape == (batch, dim)
    assert jnp.allclose(z4, z4_r, atol=1e-3, rtol=1e-3)
    assert jnp.allclose(loss1, loss1_r, atol=5e-3, rtol=5e-3)
    assert jnp.allclose(loss2, loss2_r, atol=5e-3, rtol=5e-3)

    print("KERNEL_OK")
</pallas_src>

<mosaic_0001>
module attributes {stable_mosaic.version = 11 : i64} {
  func.func @_fcnet_mi_kernel(%arg0: i32, %arg1: memref<8x128xbf16, #tpu.memory_space<vmem>>, %arg2: memref<128x384xbf16, #tpu.memory_space<vmem>>, %arg3: memref<1x384xf32, #tpu.memory_space<vmem>>, %arg4: memref<128x384xbf16, #tpu.memory_space<vmem>>, %arg5: memref<1x384xf32, #tpu.memory_space<vmem>>, %arg6: memref<128x128xbf16, #tpu.memory_space<vmem>>, %arg7: memref<1x128xf32, #tpu.memory_space<vmem>>, %arg8: memref<128x384xbf16, #tpu.memory_space<vmem>>, %arg9: memref<1x384xf32, #tpu.memory_space<vmem>>, %arg10: memref<128x256xbf16, #tpu.memory_space<vmem>>, %arg11: memref<1x256xf32, #tpu.memory_space<vmem>>, %arg12: memref<256x256xbf16, #tpu.memory_space<vmem>>, %arg13: memref<1x256xf32, #tpu.memory_space<vmem>>, %arg14: memref<256x256xbf16, #tpu.memory_space<vmem>>, %arg15: memref<1x256xf32, #tpu.memory_space<vmem>>, %arg16: memref<8x128xf32, #tpu.memory_space<vmem>>, %arg17: memref<24x128xf32, #tpu.memory_space<vmem>>) attributes {dimension_semantics = [#tpu.dimension_semantics<parallel>], iteration_bounds = array<i64: 2>, scalar_prefetch = 0 : i64, scratch_operands = 0 : i64, tpu.core_type = #tpu.core_type<tc>, window_params = [{transform_indices = @transform_0, window_bounds = array<i64: 8, 128>}, {pipeline_mode = #tpu.pipeline_mode<synchronous>, transform_indices = @transform_1, window_bounds = array<i64: 128, 384>}, {pipeline_mode = #tpu.pipeline_mode<synchronous>, transform_indices = @transform_2, window_bounds = array<i64: 1, 384>}, {pipeline_mode = #tpu.pipeline_mode<synchronous>, transform_indices = @transform_3, window_bounds = array<i64: 128, 384>}, {pipeline_mode = #tpu.pipeline_mode<synchronous>, transform_indices = @transform_4, window_bounds = array<i64: 1, 384>}, {pipeline_mode = #tpu.pipeline_mode<synchronous>, transform_indices = @transform_5, window_bounds = array<i64: 128, 128>}, {pipeline_mode = #tpu.pipeline_mode<synchronous>, transform_indices = @transform_6, window_bounds = array<i64: 1, 128>}, {pipeline_mode = #tpu.pipeline_mode<synchronous>, transform_indices = @transform_7, window_bounds = array<i64: 128, 384>}, {pipeline_mode = #tpu.pipeline_mode<synchronous>, transform_indices = @transform_8, window_bounds = array<i64: 1, 384>}, {pipeline_mode = #tpu.pipeline_mode<synchronous>, transform_indices = @transform_9, window_bounds = array<i64: 128, 256>}, {pipeline_mode = #tpu.pipeline_mode<synchronous>, transform_indices = @transform_10, window_bounds = array<i64: 1, 256>}, {pipeline_mode = #tpu.pipeline_mode<synchronous>, transform_indices = @transform_11, window_bounds = array<i64: 256, 256>}, {pipeline_mode = #tpu.pipeline_mode<synchronous>, transform_indices = @transform_12, window_bounds = array<i64: 1, 256>}, {pipeline_mode = #tpu.pipeline_mode<synchronous>, transform_indices = @transform_13, window_bounds = array<i64: 256, 256>}, {pipeline_mode = #tpu.pipeline_mode<synchronous>, transform_indices = @transform_14, window_bounds = array<i64: 1, 256>}, {transform_indices = @transform_15, window_bounds = array<i64: 8, 128>}, {transform_indices = @transform_16, window_bounds = array<i64: 24, 128>}]} {
    %c0 = arith.constant 0 : index
    %c0_0 = arith.constant 0 : index
    %0 = vector.load %arg1[%c0, %c0_0] : memref<8x128xbf16, #tpu.memory_space<vmem>>, vector<8x128xbf16>
    %c0_1 = arith.constant 0 : index
    %c0_2 = arith.constant 0 : index
    %1 = vector.load %arg2[%c0_1, %c0_2] : memref<128x384xbf16, #tpu.memory_space<vmem>>, vector<128x384xbf16>
    %cst = arith.constant dense<0.000000e+00> : vector<8x384xf32>
    %2 = tpu.matmul %0, %1, %cst {dimension_numbers = #tpu.dot_dimension_numbers<[1], [0], [0], [1], [0, 0, 1, 1], [], []>} : vector<8x128xbf16>, vector<128x384xbf16>, vector<8x384xf32> -> vector<8x384xf32>
    %c0_3 = arith.constant 0 : index
    %c0_4 = arith.constant 0 : index
    %3 = vector.load %arg3[%c0_3, %c0_4] : memref<1x384xf32, #tpu.memory_space<vmem>>, vector<1x384xf32>
    %4 = vector.broadcast %3 : vector<1x384xf32> to vector<8x384xf32>
    %5 = arith.addf %2, %4 : vector<8x384xf32>
    %6 = vector.extract_strided_slice %5 {offsets = [0, 0], sizes = [8, 128], strides = [1, 1]} : vector<8x384xf32> to vector<8x128xf32>
    %cst_5 = arith.constant 0.000000e+00 : f32
    %7 = vector.broadcast %cst_5 : f32 to vector<8x128xf32>
    %8 = arith.maximumf %6, %7 : vector<8x128xf32>
    %9 = vector.extract_strided_slice %5 {offsets = [0, 128], sizes = [8, 256], strides = [1, 1]} : vector<8x384xf32> to vector<8x256xf32>
    %cst_6 = arith.constant 0.000000e+00 : f32
    %10 = vector.broadcast %cst_6 : f32 to vector<8x256xf32>
    %11 = arith.maximumf %9, %10 : vector<8x256xf32>
    %12 = arith.truncf %11 : vector<8x256xf32> to vector<8x256xbf16>
    %13 = arith.truncf %8 : vector<8x128xf32> to vector<8x128xbf16>
    %c0_7 = arith.constant 0 : index
    %c0_8 = arith.constant 0 : index
    %14 = vector.load %arg4[%c0_7, %c0_8] : memref<128x384xbf16, #tpu.memory_space<vmem>>, vector<128x384xbf16>
    %cst_9 = arith.constant dense<0.000000e+00> : vector<8x384xf32>
    %15 = tpu.matmul %13, %14, %cst_9 {dimension_numbers = #tpu.dot_dimension_numbers<[1], [0], [0], [1], [0, 0, 1, 1], [], []>} : vector<8x128xbf16>, vector<128x384xbf16>, vector<8x384xf32> -> vector<8x384xf32>
    %c0_10 = arith.constant 0 : index
    %c0_11 = arith.constant 0 : index
    %16 = vector.load %arg5[%c0_10, %c0_11] : memref<1x384xf32, #tpu.memory_space<vmem>>, vector<1x384xf32>
    %17 = vector.broadcast %16 : vector<1x384xf32> to vector<8x384xf32>
    %18 = arith.addf %15, %17 : vector<8x384xf32>
    %19 = vector.extract_strided_slice %18 {offsets = [0, 0], sizes = [8, 128], strides = [1, 1]} : vector<8x384xf32> to vector<8x128xf32>
    %20 = vector.extract_strided_slice %18 {offsets = [0, 128], sizes = [8, 256], strides = [1, 1]} : vector<8x384xf32> to vector<8x256xf32>
    %cst_12 = arith.constant 0.000000e+00 : f32
    %21 = vector.broadcast %cst_12 : f32 to vector<8x256xf32>
    %22 = arith.maximumf %20, %21 : vector<8x256xf32>
    %23 = arith.truncf %22 : vector<8x256xf32> to vector<8x256xbf16>
    %24 = arith.truncf %19 : vector<8x128xf32> to vector<8x128xbf16>
    %c0_13 = arith.constant 0 : index
    %c0_14 = arith.constant 0 : index
    %25 = vector.load %arg6[%c0_13, %c0_14] : memref<128x128xbf16, #tpu.memory_space<vmem>>, vector<128x128xbf16>
    %cst_15 = arith.constant dense<0.000000e+00> : vector<8x128xf32>
    %26 = tpu.matmul %24, %25, %cst_15 {dimension_numbers = #tpu.dot_dimension_numbers<[1], [0], [0], [1], [0, 0, 1, 1], [], []>} : vector<8x128xbf16>, vector<128x128xbf16>, vector<8x128xf32> -> vector<8x128xf32>
    %c0_16 = arith.constant 0 : index
    %c0_17 = arith.constant 0 : index
    %27 = vector.load %arg7[%c0_16, %c0_17] : memref<1x128xf32, #tpu.memory_space<vmem>>, vector<1x128xf32>
    %28 = vector.broadcast %27 : vector<1x128xf32> to vector<8x128xf32>
    %29 = arith.addf %26, %28 : vector<8x128xf32>
    %30 = arith.truncf %29 : vector<8x128xf32> to vector<8x128xbf16>
    %c0_18 = arith.constant 0 : index
    %c0_19 = arith.constant 0 : index
    %31 = vector.load %arg8[%c0_18, %c0_19] : memref<128x384xbf16, #tpu.memory_space<vmem>>, vector<128x384xbf16>
    %cst_20 = arith.constant dense<0.000000e+00> : vector<8x384xf32>
    %32 = tpu.matmul %30, %31, %cst_20 {dimension_numbers = #tpu.dot_dimension_numbers<[1], [0], [0], [1], [0, 0, 1, 1], [], []>} : vector<8x128xbf16>, vector<128x384xbf16>, vector<8x384xf32> -> vector<8x384xf32>
    %c0_21 = arith.constant 0 : index
    %c0_22 = arith.constant 0 : index
    %33 = vector.load %arg9[%c0_21, %c0_22] : memref<1x384xf32, #tpu.memory_space<vmem>>, vector<1x384xf32>
    %34 = vector.broadcast %33 : vector<1x384xf32> to vector<8x384xf32>
    %35 = arith.addf %32, %34 : vector<8x384xf32>
    %36 = vector.extract_strided_slice %35 {offsets = [0, 0], sizes = [8, 128], strides = [1, 1]} : vector<8x384xf32> to vector<8x128xf32>
    %37 = vector.extract_strided_slice %35 {offsets = [0, 128], sizes = [8, 256], strides = [1, 1]} : vector<8x384xf32> to vector<8x256xf32>
    %cst_23 = arith.constant 0.000000e+00 : f32
    %38 = vector.broadcast %cst_23 : f32 to vector<8x256xf32>
    %39 = arith.maximumf %37, %38 : vector<8x256xf32>
    %40 = arith.truncf %39 : vector<8x256xf32> to vector<8x256xbf16>
    %c0_24 = arith.constant 0 : index
    %c0_25 = arith.constant 0 : index
    %41 = vector.load %arg16[%c0_24, %c0_25] : memref<8x128xf32, #tpu.memory_space<vmem>>, vector<8x128xf32>
    tpu.vector_store %arg16[%c0_24, %c0_25], %36 {strides = array<i32>} : memref<8x128xf32, #tpu.memory_space<vmem>>, vector<8x128xf32>,
    %42 = arith.truncf %36 : vector<8x128xf32> to vector<8x128xbf16>
    %c0_26 = arith.constant 0 : index
    %c0_27 = arith.constant 0 : index
    %43 = vector.load %arg10[%c0_26, %c0_27] : memref<128x256xbf16, #tpu.memory_space<vmem>>, vector<128x256xbf16>
    %cst_28 = arith.constant dense<0.000000e+00> : vector<8x256xf32>
    %44 = tpu.matmul %42, %43, %cst_28 {dimension_numbers = #tpu.dot_dimension_numbers<[1], [0], [0], [1], [0, 0, 1, 1], [], []>} : vector<8x128xbf16>, vector<128x256xbf16>, vector<8x256xf32> -> vector<8x256xf32>
    %c0_29 = arith.constant 0 : index
    %c0_30 = arith.constant 0 : index
    %45 = vector.load %arg11[%c0_29, %c0_30] : memref<1x256xf32, #tpu.memory_space<vmem>>, vector<1x256xf32>
    %46 = vector.broadcast %45 : vector<1x256xf32> to vector<8x256xf32>
    %47 = arith.addf %44, %46 : vector<8x256xf32>
    %cst_31 = arith.constant 0.000000e+00 : f32
    %48 = vector.broadcast %cst_31 : f32 to vector<8x256xf32>
    %49 = arith.maximumf %47, %48 : vector<8x256xf32>
    %50 = arith.truncf %49 : vector<8x256xf32> to vector<8x256xbf16>
    %c0_32 = arith.constant 0 : index
    %c0_33 = arith.constant 0 : index
    %51 = vector.load %arg12[%c0_32, %c0_33] : memref<256x256xbf16, #tpu.memory_space<vmem>>, vector<256x256xbf16>
    %cst_34 = arith.constant dense<0.000000e+00> : vector<8x256xf32>
    %52 = tpu.matmul %12, %51, %cst_34 {dimension_numbers = #tpu.dot_dimension_numbers<[1], [0], [0], [1], [0, 0, 1, 1], [], []>} : vector<8x256xbf16>, vector<256x256xbf16>, vector<8x256xf32> -> vector<8x256xf32>
    %c0_35 = arith.constant 0 : index
    %c0_36 = arith.constant 0 : index
    %53 = vector.load %arg13[%c0_35, %c0_36] : memref<1x256xf32, #tpu.memory_space<vmem>>, vector<1x256xf32>
    %54 = vector.broadcast %53 : vector<1x256xf32> to vector<8x256xf32>
    %55 = arith.addf %52, %54 : vector<8x256xf32>
    %56 = vector.extract_strided_slice %55 {offsets = [0, 0], sizes = [8, 128], strides = [1, 1]} : vector<8x256xf32> to vector<8x128xf32>
    %57 = vector.extract_strided_slice %55 {offsets = [0, 128], sizes = [8, 128], strides = [1, 1]} : vector<8x256xf32> to vector<8x128xf32>
    %58 = math.tanh %57 : vector<8x128xf32>
    %cst_37 = arith.constant 0.000000e+00 : f32
    %59 = vector.broadcast %cst_37 : f32 to vector<8x128xf32>
    %60 = arith.subf %59, %58 : vector<8x128xf32>
    %61 = math.exp %60 : vector<8x128xf32>
    %62 = arith.subf %56, %19 : vector<8x128xf32>
    %63 = arith.mulf %62, %62 : vector<8x128xf32>
    %64 = arith.mulf %63, %61 : vector<8x128xf32>
    %cst_38 = arith.constant dense<0.000000e+00> : vector<128xf32>
    %65 = vector.multi_reduction <add>, %64, %cst_38 [0] : vector<8x128xf32> to vector<128xf32>
    %c0_39 = arith.constant 0 : index
    %c0_40 = arith.constant 0 : index
    %66 = vector.load %arg17[%c0_39, %c0_40] : memref<24x128xf32, #tpu.memory_space<vmem>>, vector<1x128xf32>
    %67 = vector.shape_cast %66 : vector<1x128xf32> to vector<128xf32>
    %68 = vector.shape_cast %65 : vector<128xf32> to vector<1x128xf32>
    tpu.vector_store %arg17[%c0_39, %c0_40], %68 {strides = array<i32>} : memref<24x128xf32, #tpu.memory_space<vmem>>, vector<1x128xf32>,
    %cst_41 = arith.constant dense<0.000000e+00> : vector<128xf32>
    %69 = vector.multi_reduction <add>, %58, %cst_41 [0] : vector<8x128xf32> to vector<128xf32>
    %c1 = arith.constant 1 : index
    %c0_42 = arith.constant 0 : index
    %70 = vector.load %arg17[%c1, %c0_42] : memref<24x128xf32, #tpu.memory_space<vmem>>, vector<1x128xf32>
    %71 = vector.shape_cast %70 : vector<1x128xf32> to vector<128xf32>
    %72 = vector.shape_cast %69 : vector<128xf32> to vector<1x128xf32>
    tpu.vector_store %arg17[%c1, %c0_42], %72 {strides = array<i32>} : memref<24x128xf32, #tpu.memory_space<vmem>>, vector<1x128xf32>,
    %cst_43 = arith.constant dense<0.000000e+00> : vector<128xf32>
    %73 = vector.multi_reduction <add>, %61, %cst_43 [0] : vector<8x128xf32> to vector<128xf32>
    %c2 = arith.constant 2 : index
    %c0_44 = arith.constant 0 : index
    %74 = vector.load %arg17[%c2, %c0_44] : memref<24x128xf32, #tpu.memory_space<vmem>>, vector<1x128xf32>
    %75 = vector.shape_cast %74 : vector<1x128xf32> to vector<128xf32>
    %76 = vector.shape_cast %73 : vector<128xf32> to vector<1x128xf32>
    tpu.vector_store %arg17[%c2, %c0_44], %76 {strides = array<i32>} : memref<24x128xf32, #tpu.memory_space<vmem>>, vector<1x128xf32>,
    %77 = arith.mulf %56, %61 : vector<8x128xf32>
    %cst_45 = arith.constant dense<0.000000e+00> : vector<128xf32>
    %78 = vector.multi_reduction <add>, %77, %cst_45 [0] : vector<8x128xf32> to vector<128xf32>
    %c3 = arith.constant 3 : index
    %c0_46 = arith.constant 0 : index
    %79 = vector.load %arg17[%c3, %c0_46] : memref<24x128xf32, #tpu.memory_space<vmem>>, vector<1x128xf32>
    %80 = vector.shape_cast %79 : vector<1x128xf32> to vector<128xf32>
    %81 = vector.shape_cast %78 : vector<128xf32> to vector<1x128xf32>
    tpu.vector_store %arg17[%c3, %c0_46], %81 {strides = array<i32>} : memref<24x128xf32, #tpu.memory_space<vmem>>, vector<1x128xf32>,
    %82 = arith.mulf %56, %56 : vector<8x128xf32>
    %83 = arith.mulf %82, %61 : vector<8x128xf32>
    %cst_47 = arith.constant dense<0.000000e+00> : vector<128xf32>
    %84 = vector.multi_reduction <add>, %83, %cst_47 [0] : vector<8x128xf32> to vector<128xf32>
    %c4 = arith.constant 4 : index
    %c0_48 = arith.constant 0 : index
    %85 = vector.load %arg17[%c4, %c0_48] : memref<24x128xf32, #tpu.memory_space<vmem>>, vector<1x128xf32>
    %86 = vector.shape_cast %85 : vector<1x128xf32> to vector<128xf32>
    %87 = vector.shape_cast %84 : vector<128xf32> to vector<1x128xf32>
    tpu.vector_store %arg17[%c4, %c0_48], %87 {strides = array<i32>} : memref<24x128xf32, #tpu.memory_space<vmem>>, vector<1x128xf32>,
    %c0_49 = arith.constant 0 : index
    %c0_50 = arith.constant 0 : index
    %88 = vector.load %arg14[%c0_49, %c0_50] : memref<256x256xbf16, #tpu.memory_space<vmem>>, vector<256x256xbf16>
    %cst_51 = arith.constant dense<0.000000e+00> : vector<8x256xf32>
    %89 = tpu.matmul %23, %88, %cst_51 {dimension_numbers = #tpu.dot_dimension_numbers<[1], [0], [0], [1], [0, 0, 1, 1], [], []>} : vector<8x256xbf16>, vector<256x256xbf16>, vector<8x256xf32> -> vector<8x256xf32>
    %c0_52 = arith.constant 0 : index
    %c0_53 = arith.constant 0 : index
    %90 = vector.load %arg15[%c0_52, %c0_53] : memref<1x256xf32, #tpu.memory_space<vmem>>, vector<1x256xf32>
    %91 = vector.broadcast %90 : vector<1x256xf32> to vector<8x256xf32>
    %92 = arith.addf %89, %91 : vector<8x256xf32>
    %93 = vector.extract_strided_slice %92 {offsets = [0, 0], sizes = [8, 128], strides = [1, 1]} : vector<8x256xf32> to vector<8x128xf32>
    %94 = vector.extract_strided_slice %92 {offsets = [0, 128], sizes = [8, 128], strides = [1, 1]} : vector<8x256xf32> to vector<8x128xf32>
    %95 = math.tanh %94 : vector<8x128xf32>
    %cst_54 = arith.constant 0.000000e+00 : f32
    %96 = vector.broadcast %cst_54 : f32 to vector<8x128xf32>
    %97 = arith.subf %96, %95 : vector<8x128xf32>
    %98 = math.exp %97 : vector<8x128xf32>
    %99 = arith.subf %93, %19 : vector<8x128xf32>
    %100 = arith.mulf %99, %99 : vector<8x128xf32>
    %101 = arith.mulf %100, %98 : vector<8x128xf32>
    %cst_55 = arith.constant dense<0.000000e+00> : vector<128xf32>
    %102 = vector.multi_reduction <add>, %101, %cst_55 [0] : vector<8x128xf32> to vector<128xf32>
    %c5 = arith.constant 5 : index
    %c0_56 = arith.constant 0 : index
    %103 = vector.load %arg17[%c5, %c0_56] : memref<24x128xf32, #tpu.memory_space<vmem>>, vector<1x128xf32>
    %104 = vector.shape_cast %103 : vector<1x128xf32> to vector<128xf32>
    %105 = vector.shape_cast %102 : vector<128xf32> to vector<1x128xf32>
    tpu.vector_store %arg17[%c5, %c0_56], %105 {strides = array<i32>} : memref<24x128xf32, #tpu.memory_space<vmem>>, vector<1x128xf32>,
    %cst_57 = arith.constant dense<0.000000e+00> : vector<128xf32>
    %106 = vector.multi_reduction <add>, %95, %cst_57 [0] : vector<8x128xf32> to vector<128xf32>
    %c6 = arith.constant 6 : index
    %c0_58 = arith.constant 0 : index
    %107 = vector.load %arg17[%c6, %c0_58] : memref<24x128xf32, #tpu.memory_space<vmem>>, vector<1x128xf32>
    %108 = vector.shape_cast %107 : vector<1x128xf32> to vector<128xf32>
    %109 = vector.shape_cast %106 : vector<128xf32> to vector<1x128xf32>
    tpu.vector_store %arg17[%c6, %c0_58], %109 {strides = array<i32>} : memref<24x128xf32, #tpu.memory_space<vmem>>, vector<1x128xf32>,
    %cst_59 = arith.constant dense<0.000000e+00> : vector<128xf32>
    %110 = vector.multi_reduction <add>, %98, %cst_59 [0] : vector<8x128xf32> to vector<128xf32>
    %c7 = arith.constant 7 : index
    %c0_60 = arith.constant 0 : index
    %111 = vector.load %arg17[%c7, %c0_60] : memref<24x128xf32, #tpu.memory_space<vmem>>, vector<1x128xf32>
    %112 = vector.shape_cast %111 : vector<1x128xf32> to vector<128xf32>
    %113 = vector.shape_cast %110 : vector<128xf32> to vector<1x128xf32>
    tpu.vector_store %arg17[%c7, %c0_60], %113 {strides = array<i32>} : memref<24x128xf32, #tpu.memory_space<vmem>>, vector<1x128xf32>,
    %114 = arith.mulf %93, %98 : vector<8x128xf32>
    %cst_61 = arith.constant dense<0.000000e+00> : vector<128xf32>
    %115 = vector.multi_reduction <add>, %114, %cst_61 [0] : vector<8x128xf32> to vector<128xf32>
    %c8 = arith.constant 8 : index
    %c0_62 = arith.constant 0 : index
    %116 = vector.load %arg17[%c8, %c0_62] : memref<24x128xf32, #tpu.memory_space<vmem>>, vector<1x128xf32>
    %117 = vector.shape_cast %116 : vector<1x128xf32> to vector<128xf32>
    %118 = vector.shape_cast %115 : vector<128xf32> to vector<1x128xf32>
    tpu.vector_store %arg17[%c8, %c0_62], %118 {strides = array<i32>} : memref<24x128xf32, #tpu.memory_space<vmem>>, vector<1x128xf32>,
    %119 = arith.mulf %93, %93 : vector<8x128xf32>
    %120 = arith.mulf %119, %98 : vector<8x128xf32>
    %cst_63 = arith.constant dense<0.000000e+00> : vector<128xf32>
    %121 = vector.multi_reduction <add>, %120, %cst_63 [0] : vector<8x128xf32> to vector<128xf32>
    %c9 = arith.constant 9 : index
    %c0_64 = arith.constant 0 : index
    %122 = vector.load %arg17[%c9, %c0_64] : memref<24x128xf32, #tpu.memory_space<vmem>>, vector<1x128xf32>
    %123 = vector.shape_cast %122 : vector<1x128xf32> to vector<128xf32>
    %124 = vector.shape_cast %121 : vector<128xf32> to vector<1x128xf32>
    tpu.vector_store %arg17[%c9, %c0_64], %124 {strides = array<i32>} : memref<24x128xf32, #tpu.memory_space<vmem>>, vector<1x128xf32>,
    %c0_65 = arith.constant 0 : index
    %c0_66 = arith.constant 0 : index
    %125 = vector.load %arg14[%c0_65, %c0_66] : memref<256x256xbf16, #tpu.memory_space<vmem>>, vector<256x256xbf16>
    %cst_67 = arith.constant dense<0.000000e+00> : vector<8x256xf32>
    %126 = tpu.matmul %40, %125, %cst_67 {dimension_numbers = #tpu.dot_dimension_numbers<[1], [0], [0], [1], [0, 0, 1, 1], [], []>} : vector<8x256xbf16>, vector<256x256xbf16>, vector<8x256xf32> -> vector<8x256xf32>
    %c0_68 = arith.constant 0 : index
    %c0_69 = arith.constant 0 : index
    %127 = vector.load %arg15[%c0_68, %c0_69] : memref<1x256xf32, #tpu.memory_space<vmem>>, vector<1x256xf32>
    %128 = vector.broadcast %127 : vector<1x256xf32> to vector<8x256xf32>
    %129 = arith.addf %126, %128 : vector<8x256xf32>
    %130 = vector.extract_strided_slice %129 {offsets = [0, 0], sizes = [8, 128], strides = [1, 1]} : vector<8x256xf32> to vector<8x128xf32>
    %131 = vector.extract_strided_slice %129 {offsets = [0, 128], sizes = [8, 128], strides = [1, 1]} : vector<8x256xf32> to vector<8x128xf32>
    %132 = math.tanh %131 : vector<8x128xf32>
    %cst_70 = arith.constant 0.000000e+00 : f32
    %133 = vector.broadcast %cst_70 : f32 to vector<8x128xf32>
    %134 = arith.subf %133, %132 : vector<8x128xf32>
    %135 = math.exp %134 : vector<8x128xf32>
    %136 = arith.subf %130, %19 : vector<8x128xf32>
    %137 = arith.mulf %136, %136 : vector<8x128xf32>
    %138 = arith.mulf %137, %135 : vector<8x128xf32>
    %cst_71 = arith.constant dense<0.000000e+00> : vector<128xf32>
    %139 = vector.multi_reduction <add>, %138, %cst_71 [0] : vector<8x128xf32> to vector<128xf32>
    %c10 = arith.constant 10 : index
    %c0_72 = arith.constant 0 : index
    %140 = vector.load %arg17[%c10, %c0_72] : memref<24x128xf32, #tpu.memory_space<vmem>>, vector<1x128xf32>
    %141 = vector.shape_cast %140 : vector<1x128xf32> to vector<128xf32>
    %142 = vector.shape_cast %139 : vector<128xf32> to vector<1x128xf32>
    tpu.vector_store %arg17[%c10, %c0_72], %142 {strides = array<i32>} : memref<24x128xf32, #tpu.memory_space<vmem>>, vector<1x128xf32>,
    %cst_73 = arith.constant dense<0.000000e+00> : vector<128xf32>
    %143 = vector.multi_reduction <add>, %132, %cst_73 [0] : vector<8x128xf32> to vector<128xf32>
    %c11 = arith.constant 11 : index
    %c0_74 = arith.constant 0 : index
    %144 = vector.load %arg17[%c11, %c0_74] : memref<24x128xf32, #tpu.memory_space<vmem>>, vector<1x128xf32>
    %145 = vector.shape_cast %144 : vector<1x128xf32> to vector<128xf32>
    %146 = vector.shape_cast %143 : vector<128xf32> to vector<1x128xf32>
    tpu.vector_store %arg17[%c11, %c0_74], %146 {strides = array<i32>} : memref<24x128xf32, #tpu.memory_space<vmem>>, vector<1x128xf32>,
    %cst_75 = arith.constant dense<0.000000e+00> : vector<128xf32>
    %147 = vector.multi_reduction <add>, %135, %cst_75 [0] : vector<8x128xf32> to vector<128xf32>
    %c12 = arith.constant 12 : index
    %c0_76 = arith.constant 0 : index
    %148 = vector.load %arg17[%c12, %c0_76] : memref<24x128xf32, #tpu.memory_space<vmem>>, vector<1x128xf32>
    %149 = vector.shape_cast %148 : vector<1x128xf32> to vector<128xf32>
    %150 = vector.shape_cast %147 : vector<128xf32> to vector<1x128xf32>
    tpu.vector_store %arg17[%c12, %c0_76], %150 {strides = array<i32>} : memref<24x128xf32, #tpu.memory_space<vmem>>, vector<1x128xf32>,
    %151 = arith.mulf %130, %135 : vector<8x128xf32>
    %cst_77 = arith.constant dense<0.000000e+00> : vector<128xf32>
    %152 = vector.multi_reduction <add>, %151, %cst_77 [0] : vector<8x128xf32> to vector<128xf32>
    %c13 = arith.constant 13 : index
    %c0_78 = arith.constant 0 : index
    %153 = vector.load %arg17[%c13, %c0_78] : memref<24x128xf32, #tpu.memory_space<vmem>>, vector<1x128xf32>
    %154 = vector.shape_cast %153 : vector<1x128xf32> to vector<128xf32>
    %155 = vector.shape_cast %152 : vector<128xf32> to vector<1x128xf32>
    tpu.vector_store %arg17[%c13, %c0_78], %155 {strides = array<i32>} : memref<24x128xf32, #tpu.memory_space<vmem>>, vector<1x128xf32>,
    %156 = arith.mulf %130, %130 : vector<8x128xf32>
    %157 = arith.mulf %156, %135 : vector<8x128xf32>
    %cst_79 = arith.constant dense<0.000000e+00> : vector<128xf32>
    %158 = vector.multi_reduction <add>, %157, %cst_79 [0] : vector<8x128xf32> to vector<128xf32>
    %c14 = arith.constant 14 : index
    %c0_80 = arith.constant 0 : index
    %159 = vector.load %arg17[%c14, %c0_80] : memref<24x128xf32, #tpu.memory_space<vmem>>, vector<1x128xf32>
    %160 = vector.shape_cast %159 : vector<1x128xf32> to vector<128xf32>
    %161 = vector.shape_cast %158 : vector<128xf32> to vector<1x128xf32>
    tpu.vector_store %arg17[%c14, %c0_80], %161 {strides = array<i32>} : memref<24x128xf32, #tpu.memory_space<vmem>>, vector<1x128xf32>,
    %c0_81 = arith.constant 0 : index
    %c0_82 = arith.constant 0 : index
    %162 = vector.load %arg12[%c0_81, %c0_82] : memref<256x256xbf16, #tpu.memory_space<vmem>>, vector<256x256xbf16>
    %cst_83 = arith.constant dense<0.000000e+00> : vector<8x256xf32>
    %163 = tpu.matmul %50, %162, %cst_83 {dimension_numbers = #tpu.dot_dimension_numbers<[1], [0], [0], [1], [0, 0, 1, 1], [], []>} : vector<8x256xbf16>, vector<256x256xbf16>, vector<8x256xf32> -> vector<8x256xf32>
    %c0_84 = arith.constant 0 : index
    %c0_85 = arith.constant 0 : index
    %164 = vector.load %arg13[%c0_84, %c0_85] : memref<1x256xf32, #tpu.memory_space<vmem>>, vector<1x256xf32>
    %165 = vector.broadcast %164 : vector<1x256xf32> to vector<8x256xf32>
    %166 = arith.addf %163, %165 : vector<8x256xf32>
    %167 = vector.extract_strided_slice %166 {offsets = [0, 0], sizes = [8, 128], strides = [1, 1]} : vector<8x256xf32> to vector<8x128xf32>
    %168 = vector.extract_strided_slice %166 {offsets = [0, 128], sizes = [8, 128], strides = [1, 1]} : vector<8x256xf32> to vector<8x128xf32>
    %169 = math.tanh %168 : vector<8x128xf32>
    %cst_86 = arith.constant 0.000000e+00 : f32
    %170 = vector.broadcast %cst_86 : f32 to vector<8x128xf32>
    %171 = arith.subf %170, %169 : vector<8x128xf32>
    %172 = math.exp %171 : vector<8x128xf32>
    %173 = arith.subf %167, %19 : vector<8x128xf32>
    %174 = arith.mulf %173, %173 : vector<8x128xf32>
    %175 = arith.mulf %174, %172 : vector<8x128xf32>
    %cst_87 = arith.constant dense<0.000000e+00> : vector<128xf32>
    %176 = vector.multi_reduction <add>, %175, %cst_87 [0] : vector<8x128xf32> to vector<128xf32>
    %c15 = arith.constant 15 : index
    %c0_88 = arith.constant 0 : index
    %177 = vector.load %arg17[%c15, %c0_88] : memref<24x128xf32, #tpu.memory_space<vmem>>, vector<1x128xf32>
    %178 = vector.shape_cast %177 : vector<1x128xf32> to vector<128xf32>
    %179 = vector.shape_cast %176 : vector<128xf32> to vector<1x128xf32>
    tpu.vector_store %arg17[%c15, %c0_88], %179 {strides = array<i32>} : memref<24x128xf32, #tpu.memory_space<vmem>>, vector<1x128xf32>,
    %cst_89 = arith.constant dense<0.000000e+00> : vector<128xf32>
    %180 = vector.multi_reduction <add>, %169, %cst_89 [0] : vector<8x128xf32> to vector<128xf32>
    %c16 = arith.constant 16 : index
    %c0_90 = arith.constant 0 : index
    %181 = vector.load %arg17[%c16, %c0_90] : memref<24x128xf32, #tpu.memory_space<vmem>>, vector<1x128xf32>
    %182 = vector.shape_cast %181 : vector<1x128xf32> to vector<128xf32>
    %183 = vector.shape_cast %180 : vector<128xf32> to vector<1x128xf32>
    tpu.vector_store %arg17[%c16, %c0_90], %183 {strides = array<i32>} : memref<24x128xf32, #tpu.memory_space<vmem>>, vector<1x128xf32>,
    %cst_91 = arith.constant dense<0.000000e+00> : vector<128xf32>
    %184 = vector.multi_reduction <add>, %172, %cst_91 [0] : vector<8x128xf32> to vector<128xf32>
    %c17 = arith.constant 17 : index
    %c0_92 = arith.constant 0 : index
    %185 = vector.load %arg17[%c17, %c0_92] : memref<24x128xf32, #tpu.memory_space<vmem>>, vector<1x128xf32>
    %186 = vector.shape_cast %185 : vector<1x128xf32> to vector<128xf32>
    %187 = vector.shape_cast %184 : vector<128xf32> to vector<1x128xf32>
    tpu.vector_store %arg17[%c17, %c0_92], %187 {strides = array<i32>} : memref<24x128xf32, #tpu.memory_space<vmem>>, vector<1x128xf32>,
    %188 = arith.mulf %167, %172 : vector<8x128xf32>
    %cst_93 = arith.constant dense<0.000000e+00> : vector<128xf32>
    %189 = vector.multi_reduction <add>, %188, %cst_93 [0] : vector<8x128xf32> to vector<128xf32>
    %c18 = arith.constant 18 : index
    %c0_94 = arith.constant 0 : index
    %190 = vector.load %arg17[%c18, %c0_94] : memref<24x128xf32, #tpu.memory_space<vmem>>, vector<1x128xf32>
    %191 = vector.shape_cast %190 : vector<1x128xf32> to vector<128xf32>
    %192 = vector.shape_cast %189 : vector<128xf32> to vector<1x128xf32>
    tpu.vector_store %arg17[%c18, %c0_94], %192 {strides = array<i32>} : memref<24x128xf32, #tpu.memory_space<vmem>>, vector<1x128xf32>,
    %193 = arith.mulf %167, %167 : vector<8x128xf32>
    %194 = arith.mulf %193, %172 : vector<8x128xf32>
    %cst_95 = arith.constant dense<0.000000e+00> : vector<128xf32>
    %195 = vector.multi_reduction <add>, %194, %cst_95 [0] : vector<8x128xf32> to vector<128xf32>
    %c19 = arith.constant 19 : index
    %c0_96 = arith.constant 0 : index
    %196 = vector.load %arg17[%c19, %c0_96] : memref<24x128xf32, #tpu.memory_space<vmem>>, vector<1x128xf32>
    %197 = vector.shape_cast %196 : vector<1x128xf32> to vector<128xf32>
    %198 = vector.shape_cast %195 : vector<128xf32> to vector<1x128xf32>
    tpu.vector_store %arg17[%c19, %c0_96], %198 {strides = array<i32>} : memref<24x128xf32, #tpu.memory_space<vmem>>, vector<1x128xf32>,
    %cst_97 = arith.constant dense<0.000000e+00> : vector<128xf32>
    %199 = vector.multi_reduction <add>, %19, %cst_97 [0] : vector<8x128xf32> to vector<128xf32>
    %c20 = arith.constant 20 : index
    %c0_98 = arith.constant 0 : index
    %200 = vector.load %arg17[%c20, %c0_98] : memref<24x128xf32, #tpu.memory_space<vmem>>, vector<1x128xf32>
    %201 = vector.shape_cast %200 : vector<1x128xf32> to vector<128xf32>
    %202 = vector.shape_cast %199 : vector<128xf32> to vector<1x128xf32>
    tpu.vector_store %arg17[%c20, %c0_98], %202 {strides = array<i32>} : memref<24x128xf32, #tpu.memory_space<vmem>>, vector<1x128xf32>,
    %203 = arith.mulf %19, %19 : vector<8x128xf32>
    %cst_99 = arith.constant dense<0.000000e+00> : vector<128xf32>
    %204 = vector.multi_reduction <add>, %203, %cst_99 [0] : vector<8x128xf32> to vector<128xf32>
    %c21 = arith.constant 21 : index
    %c0_100 = arith.constant 0 : index
    %205 = vector.load %arg17[%c21, %c0_100] : memref<24x128xf32, #tpu.memory_space<vmem>>, vector<1x128xf32>
    %206 = vector.shape_cast %205 : vector<1x128xf32> to vector<128xf32>
    %207 = vector.shape_cast %204 : vector<128xf32> to vector<1x128xf32>
    tpu.vector_store %arg17[%c21, %c0_100], %207 {strides = array<i32>} : memref<24x128xf32, #tpu.memory_space<vmem>>, vector<1x128xf32>,
    %cst_101 = arith.constant 0.000000e+00 : f32
    %208 = vector.broadcast %cst_101 : f32 to vector<2x128xf32>
    %c22 = arith.constant 22 : index
    %c0_102 = arith.constant 0 : index
    %209 = vector.load %arg17[%c22, %c0_102] : memref<24x128xf32, #tpu.memory_space<vmem>>, vector<2x128xf32>
    tpu.vector_store %arg17[%c22, %c0_102], %208 {strides = array<i32>} : memref<24x128xf32, #tpu.memory_space<vmem>>, vector<2x128xf32>,
    return
  }
  func.func @transform_0(%arg0: i32) -> (i32, i32) {
    %c0_i32 = arith.constant 0 : i32
    %c0_i32_0 = arith.constant 0 : i32
    return %arg0, %c0_i32 : i32, i32
  }
  func.func @transform_1(%arg0: i32) -> (i32, i32) {
    %c0_i32 = arith.constant 0 : i32
    %c0_i32_0 = arith.constant 0 : i32
    %c0_i32_1 = arith.constant 0 : i32
    return %c0_i32, %c0_i32_0 : i32, i32
  }
  func.func @transform_2(%arg0: i32) -> (i32, i32) {
    %c0_i32 = arith.constant 0 : i32
    %c0_i32_0 = arith.constant 0 : i32
    %c0_i32_1 = arith.constant 0 : i32
    return %c0_i32, %c0_i32_0 : i32, i32
  }
  func.func @transform_3(%arg0: i32) -> (i32, i32) {
    %c0_i32 = arith.constant 0 : i32
    %c0_i32_0 = arith.constant 0 : i32
    %c0_i32_1 = arith.constant 0 : i32
    return %c0_i32, %c0_i32_0 : i32, i32
  }
  func.func @transform_4(%arg0: i32) -> (i32, i32) {
    %c0_i32 = arith.constant 0 : i32
    %c0_i32_0 = arith.constant 0 : i32
    %c0_i32_1 = arith.constant 0 : i32
    return %c0_i32, %c0_i32_0 : i32, i32
  }
  func.func @transform_5(%arg0: i32) -> (i32, i32) {
    %c0_i32 = arith.constant 0 : i32
    %c0_i32_0 = arith.constant 0 : i32
    %c0_i32_1 = arith.constant 0 : i32
    return %c0_i32, %c0_i32_0 : i32, i32
  }
  func.func @transform_6(%arg0: i32) -> (i32, i32) {
    %c0_i32 = arith.constant 0 : i32
    %c0_i32_0 = arith.constant 0 : i32
    %c0_i32_1 = arith.constant 0 : i32
    return %c0_i32, %c0_i32_0 : i32, i32
  }
  func.func @transform_7(%arg0: i32) -> (i32, i32) {
    %c0_i32 = arith.constant 0 : i32
    %c0_i32_0 = arith.constant 0 : i32
    %c0_i32_1 = arith.constant 0 : i32
    return %c0_i32, %c0_i32_0 : i32, i32
  }
  func.func @transform_8(%arg0: i32) -> (i32, i32) {
    %c0_i32 = arith.constant 0 : i32
    %c0_i32_0 = arith.constant 0 : i32
    %c0_i32_1 = arith.constant 0 : i32
    return %c0_i32, %c0_i32_0 : i32, i32
  }
  func.func @transform_9(%arg0: i32) -> (i32, i32) {
    %c0_i32 = arith.constant 0 : i32
    %c0_i32_0 = arith.constant 0 : i32
    %c0_i32_1 = arith.constant 0 : i32
    return %c0_i32, %c0_i32_0 : i32, i32
  }
  func.func @transform_10(%arg0: i32) -> (i32, i32) {
    %c0_i32 = arith.constant 0 : i32
    %c0_i32_0 = arith.constant 0 : i32
    %c0_i32_1 = arith.constant 0 : i32
    return %c0_i32, %c0_i32_0 : i32, i32
  }
  func.func @transform_11(%arg0: i32) -> (i32, i32) {
    %c0_i32 = arith.constant 0 : i32
    %c0_i32_0 = arith.constant 0 : i32
    %c0_i32_1 = arith.constant 0 : i32
    return %c0_i32, %c0_i32_0 : i32, i32
  }
  func.func @transform_12(%arg0: i32) -> (i32, i32) {
    %c0_i32 = arith.constant 0 : i32
    %c0_i32_0 = arith.constant 0 : i32
    %c0_i32_1 = arith.constant 0 : i32
    return %c0_i32, %c0_i32_0 : i32, i32
  }
  func.func @transform_13(%arg0: i32) -> (i32, i32) {
    %c0_i32 = arith.constant 0 : i32
    %c0_i32_0 = arith.constant 0 : i32
    %c0_i32_1 = arith.constant 0 : i32
    return %c0_i32, %c0_i32_0 : i32, i32
  }
  func.func @transform_14(%arg0: i32) -> (i32, i32) {
    %c0_i32 = arith.constant 0 : i32
    %c0_i32_0 = arith.constant 0 : i32
    %c0_i32_1 = arith.constant 0 : i32
    return %c0_i32, %c0_i32_0 : i32, i32
  }
  func.func @transform_15(%arg0: i32) -> (i32, i32) {
    %c0_i32 = arith.constant 0 : i32
    %c0_i32_0 = arith.constant 0 : i32
    return %arg0, %c0_i32 : i32, i32
  }
  func.func @transform_16(%arg0: i32) -> (i32, i32) {
    %c0_i32 = arith.constant 0 : i32
    %c0_i32_0 = arith.constant 0 : i32
    return %arg0, %c0_i32 : i32, i32
  }
}

</mosaic_0001>

<bundles_post_ra>
// kernel: fcnet_with_mi.1
= control target key start
LH: loop header
LB: loop body
LE: loop exit
PB: predicated region body
PF: predicated region fallthrough
CT: control target
= control target key end

     0   :  { %s5592_s0 = inlined_call_operand.vmem [shape: bf16[16,128], index: 0, kind: input, shape index: {}]   ;;  %s5593_s1 = inlined_call_operand.vmem [shape: bf16[128,384], index: 1, kind: input, shape index: {}]   ;;  %s5594_s2 = inlined_call_operand.vmem [shape: f32[1,384], index: 2, kind: input, shape index: {}]   ;;  %s5595_s3 = inlined_call_operand.vmem [shape: bf16[128,384], index: 3, kind: input, shape index: {}]   ;;  %s5596_s4 = inlined_call_operand.vmem [shape: f32[1,384], index: 4, kind: input, shape index: {}]   ;;  %s5597_s5 = inlined_call_operand.vmem [shape: bf16[128,128], index: 5, kind: input, shape index: {}]   ;;  %s5598_s6 = inlined_call_operand.vmem [shape: f32[1,128], index: 6, kind: input, shape index: {}]   ;;  %s5599_s7 = inlined_call_operand.vmem [shape: bf16[128,384], index: 7, kind: input, shape index: {}]   ;;  %s5600_s8 = inlined_call_operand.vmem [shape: f32[1,384], index: 8, kind: input, shape index: {}]   ;;  %s5601_s9 = inlined_call_operand.vmem [shape: bf16[128,256], index: 9, kind: input, shape index: {}]   ;;  %s5602_s10 = inlined_call_operand.vmem [shape: f32[1,256], index: 10, kind: input, shape index: {}]   ;;  %s5603_s11 = inlined_call_operand.vmem [shape: bf16[256,256], index: 11, kind: input, shape index: {}]   ;;  %s5604_s12 = inlined_call_operand.vmem [shape: f32[1,256], index: 12, kind: input, shape index: {}]   ;;  %s5605_s13 = inlined_call_operand.vmem [shape: bf16[256,256], index: 13, kind: input, shape index: {}]   ;;  %s5606_s14 = inlined_call_operand.vmem [shape: f32[1,256], index: 14, kind: input, shape index: {}]   ;;  %s5607_s15 = inlined_call_operand.hbm [shape: f32[16,128], index: 15, kind: output, shape index: {0}]   ;;  %s5608_s16 = inlined_call_operand.vmem [shape: f32[48,128], index: 16, kind: output, shape index: {1}]  }
   0x1   :  { %5619 = sst [smem:[#allocation12_spill]] %s5592_s0 }
   0x2   :  { %5620 = sst [smem:[#allocation13_spill]] %s5593_s1 }
   0x3   :  { %22 = vsyncpa [#allocation3], 0 }
   0x4   :  { %24 = vsyncpa [#allocation3 + $0x1], 0  ;;  %s4027_s21 = smov 0   ;;  %s4029_s22 = smov 0  }
   0x5   :  { %s4031_s23 = smov 0   ;;  %s4033_s24 = smov 0  }
   0x6 LB: > { %5621 = sst [smem:[#allocation5_spill]] %s3927_s21  ;;  %s4048_s25 = sadd.s32 4294967295, %s3939_s24   ;;  %s3939_s24 = sphi %s4033_s24, %s5638_s24   ;;  %s3935_s23 = sphi %s4031_s23, %s5643_s23   ;;  %s3931_s22 = sphi %s4029_s22, %s5642_s22   ;;  %s3927_s21 = sphi %s4027_s21, %s5641_s21  }
   0x7   : > { %5622 = sst [smem:[#allocation6_spill]] %s3935_s23  ;;  %s2689_s26 = sadd.s32 4294967294, %s3939_s24  }
   0x8   : > { %5623 = sst [smem:[#allocation7_spill]] %s3939_s24  ;;  %s4052_s27 = sadd.s32 1, %s3939_s24  }
   0x9   : > { %5624 = sst [smem:[#allocation8_spill]] %s4052_s27  ;;  %s357_s28 = sadd.s32 1, %s3935_s23 }
   0xa   : > { %s354_s29 = ssub.s32 %s3939_s24, %s4052_s27  ;;  %p367_p0 = scmp.ne.s32.totalorder %s3935_s23, %s3931_s22 }
   0xb   : > { %p355_p1 = scmp.eq.s32.totalorder %s354_s29, 0  ;;  %p368_p2 = scmp.eq.s32.totalorder %s4048_s25, 1 }
   0xc   : > { %p373_p3 = scmp.ne.s32.totalorder %s3931_s22, %s3927_s21  ;;  %p374_p4 = scmp.eq.s32.totalorder %s2689_s26, 1 }
   0xd   : > { %s4063_s30 = scalar_select %p355_p1, %s3935_s23, %s357_s28  }
   0xe   : > { %p4065_p5 = por %p368_p2, %p367_p0  ;;  %p4069_p6 = por %p374_p4, %p373_p3 }
   0xf   : > { %5625 = sst [smem:[#allocation9_spill]] %s4063_s30  ;;  %p2692_p7 = scmp.ge.s32.totalorder %s3939_s24, 1 }
  0x10   : > { %s5626_s0 = scalar_select %p4065_p5, 1, 0 }
  0x11   : > { %s5628_s17 = scalar_select %p4069_p6, 1, 0 }
  0x12   : > { %5627 = sst [smem:[#allocation10_spill]] %s5626_s0  ;;  %p467_p8 = scmp.lt.s32.totalorder %s3939_s24, 3 }
  0x13   : > { %5629 = sst [smem:[#allocation11_spill]] %s5628_s17 }
  0x14   : > { %p468_p9 = pnand %p2692_p7, %p467_p8 }
  0x15   : > { %s5630_s1 = sld [smem:[#allocation13_spill]] (!%p468_p9)  ;;  %p521_p10 = scmp.lt.s32.totalorder (!%p468_p9), %s4048_s25, 1 }
  0x16   : > { %471 = sbr.rel (%p468_p9) target bundleno = 911 (0x38f), region = 80  ;;  %s5631_s29 = sld [smem:[#allocation12_spill]] (!%p468_p9) }
  0x17   : > { %s5617_s0 = sand.u32 (!%p468_p9), 1, %s3931_s22  }
  0x18   : > { %s5087_s20 = sshll.u32 (!%p468_p9), %s5617_s0, 3 }
  0x19   : > { %s5618_s28 = scalar_lea.vmem (!%p468_p9), [#allocation2], %s5087_s20  ;;  %s5632_s18 = scalar_lea.vmem (!%p468_p9), [#allocation2], %s5087_s20 }
  0x1a   : > { %s2598_s19 = sshll.u32 (!%p468_p9), %s5632_s18, 4  ;;  %s2599_s19 = int_to_ptr.vmem [resolvable:$true] %s2598_s19 }
  0x1b   : > { %v2782_v0 = vld [vmem:[%s5630_s1 + $0xa8] sm:$0xf]  ;;  %v3618_v1 = vld [vmem:[%s5630_s1 + $0xb0] sm:$0xf0]  ;;  %v2770_v2 = vld [vmem:[%s5630_s1 + $0x90] sm:$0xf] }
  0x1c   : > { %v2783_v3 = vor.u32 %v3618_v1, %v2782_v0  ;;  %v3615_v4 = vld [vmem:[%s5630_s1 + $0x98] sm:$0xf0]  ;;  %v2758_v6 = vld [vmem:[%s5630_s1 + $0x78] sm:$0xf]  ;;  %v3612_v7 = vld [vmem:[%s5630_s1 + $0x80] sm:$0xf0] }
  0x1d   : > { %v2771_v5 = vor.u32 %v3615_v4, %v2770_v2  ;;  %v3617_v8 = vld [vmem:[%s5630_s1 + $0xac] sm:$0xf]  ;;  %v2784_v9 = vld [vmem:[%s5630_s1 + $0xb4] sm:$0xf0]  ;;  %v3614_v10 = vld [vmem:[%s5630_s1 + $0x94] sm:$0xf]  ;;  %v2759_v12 = vor.u32 %v3612_v7, %v2758_v6 }
  0x1e   : > { %700 = vmatpush.bf16.msra.mxu0 %v2783_v3  ;;  %v2772_v11 = vld [vmem:[%s5630_s1 + $0x9c] sm:$0xf0]  ;;  %v2787_v13 = vor.u32 %v3617_v8, %v2784_v9  ;;  %v3609_v15 = vld [vmem:[%s5630_s1 + $0x68] sm:$0xf0]  ;;  %v3611_v17 = vld [vmem:[%s5630_s1 + $0x7c] sm:$0xf] }
  0x1f   : > { %v2746_v14 = vld [vmem:[%s5630_s1 + $0x60] sm:$0xf]  ;;  %v2775_v16 = vor.u32 %v3614_v10, %v2772_v11  ;;  %v2760_v18 = vld [vmem:[%s5630_s1 + $0x84] sm:$0xf0]  ;;  %v3606_v21 = vld [vmem:[%s5630_s1 + $0x50] sm:$0xf0] }
  0x20   : > { %713 = vmatpush.bf16.msra.mxu1 %v2787_v13  ;;  %v2747_v19 = vor.u32 %v3609_v15, %v2746_v14  ;;  %v2734_v20 = vld [vmem:[%s5630_s1 + $0x48] sm:$0xf]  ;;  %v3642_v23 = vld [vmem:[%s5595_s3 + $0xb0] sm:$0xf0]  ;;  %v2763_v24 = vor.u32 %v3611_v17, %v2760_v18  ;;  %v3608_v25 = vld [vmem:[%s5630_s1 + $0x64] sm:$0xf] }
  0x21   : > { %v2878_v22 = vld [vmem:[%s5595_s3 + $0xa8] sm:$0xf]  ;;  %v2748_v27 = vld [vmem:[%s5630_s1 + $0x6c] sm:$0xf0]  ;;  %v3639_v29 = vld [vmem:[%s5595_s3 + $0x98] sm:$0xf0]  ;;  %v2735_v30 = vor.u32 %v3606_v21, %v2734_v20 }
  0x22   : > { %701 = vmatpush.bf16.msra.mxu0 %v2771_v5  ;;  %v2879_v26 = vor.u32 %v3642_v23, %v2878_v22  ;;  %v2866_v28 = vld [vmem:[%s5595_s3 + $0x90] sm:$0xf]  ;;  %v3603_v33 = vld [vmem:[%s5630_s1 + $0x38] sm:$0xf0]  ;;  %v2854_v34 = vld [vmem:[%s5595_s3 + $0x78] sm:$0xf]  ;;  %v2751_v36 = vor.u32 %v3608_v25, %v2748_v27 }
  0x23   : > { %v2722_v31 = vld [vmem:[%s5630_s1 + $0x30] sm:$0xf]  ;;  %v2867_v32 = vor.u32 %v3639_v29, %v2866_v28  ;;  %v3636_v35 = vld [vmem:[%s5595_s3 + $0x80] sm:$0xf0]  ;;  %v3605_v37 = vld [vmem:[%s5630_s1 + $0x4c] sm:$0xf] }
  0x24   : > { %714 = vmatpush.bf16.msra.mxu1 %v2775_v16  ;;  %913 = vmatpush.bf16.msra.mxu3 %v2879_v26  ;;  %v2736_v38 = vld [vmem:[%s5630_s1 + $0x54] sm:$0xf0]  ;;  %v2723_v39 = vor.u32 %v3603_v33, %v2722_v31  ;;  %v2855_v41 = vor.u32 %v3636_v35, %v2854_v34  ;;  %v3600_v42 = vld [vmem:[%s5630_s1 + $0x20] sm:$0xf0]  ;;  %v2842_v43 = vld [vmem:[%s5595_s3 + $0x60] sm:$0xf] }
  0x25   : > { %v2710_v40 = vld [vmem:[%s5630_s1 + $0x18] sm:$0xf]  ;;  %v3633_v44 = vld [vmem:[%s5595_s3 + $0x68] sm:$0xf0]  ;;  %s522_s24 = scalar_select %p521_p10, %s4048_s25, 1  ;;  %v2739_v45 = vor.u32 %v3605_v37, %v2736_v38 }
  0x26   : > { %702 = vmatpush.bf16.msra.mxu0 %v2759_v12  ;;  %v3602_v46 = vld [vmem:[%s5630_s1 + $0x34] sm:$0xf]  ;;  %v2724_v47 = vld [vmem:[%s5630_s1 + $0x3c] sm:$0xf0]  ;;  %v2711_v48 = vor.u32 %v3600_v42, %v2710_v40  ;;  %v3597_v50 = vld [vmem:[%s5630_s1 + $0x8] sm:$0xf0]  ;;  %v2843_v51 = vor.u32 %v3633_v44, %v2842_v43 }
  0x27   : > { %v2698_v49 = vld [vmem:[%s5630_s1] sm:$0xf]  ;;  %v2830_v52 = vld [vmem:[%s5595_s3 + $0x48] sm:$0xf]  ;;  %v3630_v53 = vld [vmem:[%s5595_s3 + $0x50] sm:$0xf0]  ;;  %v2727_v54 = vor.u32 %v3602_v46, %v2724_v47 }
  0x28   : > { %715 = vmatpush.bf16.msra.mxu1 %v2763_v24  ;;  %914 = vmatpush.bf16.msra.mxu3 %v2867_v32  ;;  %s2694_s23 = sshll.u32 %s522_s24, 2  ;;  %v3641_v55 = vld [vmem:[%s5595_s3 + $0xac] sm:$0xf]  ;;  %v2880_v56 = vld [vmem:[%s5595_s3 + $0xb4] sm:$0xf0]  ;;  %v2699_v59 = vor.u32 %v3597_v50, %v2698_v49  ;;  %v2831_v60 = vor.u32 %v3630_v53, %v2830_v52  ;;  %s525_s24 = smul.u32 3, %s4048_s25 }
  0x29   : > { %v3599_v57 = vld [vmem:[%s5630_s1 + $0x1c] sm:$0xf]  ;;  %v2712_v58 = vld [vmem:[%s5630_s1 + $0x24] sm:$0xf0]  ;;  %s524_s30 = scalar_lea.vmem %s5631_s29, %s2694_s23  ;;  %v2883_v61 = vor.u32 %v3641_v55, %v2880_v56  ;;  %v2818_v62 = vld [vmem:[%s5595_s3 + $0x30] sm:$0xf] }
  0x2a   : > { %703 = vmatpush.bf16.msra.mxu0 %v2747_v19  ;;  %v3627_v63 = vld [vmem:[%s5595_s3 + $0x38] sm:$0xf0]  ;;  %v2715_v0 = vor.u32 %v3599_v57, %v2712_v58  ;;  %v3638_v1 = vld [vmem:[%s5595_s3 + $0x94] sm:$0xf]  ;;  %v2868_v2 = vld [vmem:[%s5595_s3 + $0x9c] sm:$0xf0] }
  0x2b   : > { %v3596_v3 = vld [vmem:[%s5630_s1 + $0x4] sm:$0xf]  ;;  %v2700_v4 = vld [vmem:[%s5630_s1 + $0xc] sm:$0xf0]  ;;  %v4224_v5 = vld [vmem:[%s524_s30] sm:$0xf]  ;;  %v2819_v8 = vor.u32 %v3627_v63, %v2818_v62  ;;  %v2871_v9 = vor.u32 %v3638_v1, %v2868_v2 }
  0x2c   : > { %716 = vmatpush.bf16.msra.mxu1 %v2751_v36  ;;  %915 = vmatpush.bf16.msra.mxu3 %v2855_v41  ;;  %v2886_v6 = vld [vmem:[%s5595_s3 + $0xb0] sm:$0xf]  ;;  %v3643_v7 = vld [vmem:[%s5595_s3 + $0xb8] sm:$0xf0]  ;;  %v2703_v10 = vor.u32 %v3596_v3, %v2700_v4  ;;  %v2856_v12 = vld [vmem:[%s5595_s3 + $0x84] sm:$0xf0] }
  0x2d   : > { %v3635_v11 = vld [vmem:[%s5595_s3 + $0x7c] sm:$0xf]  ;;  %v2887_v13 = vor.u32 %v3643_v7, %v2886_v6  ;;  %v2874_v14 = vld [vmem:[%s5595_s3 + $0x98] sm:$0xf]  ;;  %v3640_v15 = vld [vmem:[%s5595_s3 + $0xa0] sm:$0xf0] }
  0x2e   : > { %704 = vmatpush.bf16.msra.mxu0 %v2735_v30  ;;  %v2859_v16 = vor.u32 %v3635_v11, %v2856_v12  ;;  %v3632_v17 = vld [vmem:[%s5595_s3 + $0x64] sm:$0xf]  ;;  %v2844_v18 = vld [vmem:[%s5595_s3 + $0x6c] sm:$0xf0]  ;;  %v2875_v19 = vor.u32 %v3640_v15, %v2874_v14  ;;  %v2862_v20 = vld [vmem:[%s5595_s3 + $0x80] sm:$0xf] }
  0x2f   : > { %v3637_v21 = vld [vmem:[%s5595_s3 + $0x88] sm:$0xf0]  ;;  %v2847_v22 = vor.u32 %v3632_v17, %v2844_v18  ;;  %v2832_v24 = vld [vmem:[%s5595_s3 + $0x54] sm:$0xf0]  ;;  %v2850_v26 = vld [vmem:[%s5595_s3 + $0x68] sm:$0xf] }
  0x30   : > { %717 = vmatpush.bf16.msra.mxu1 %v2739_v45  ;;  %916 = vmatpush.bf16.msra.mxu3 %v2843_v51  ;;  %v3629_v23 = vld [vmem:[%s5595_s3 + $0x4c] sm:$0xf]  ;;  %v2863_v25 = vor.u32 %v3637_v21, %v2862_v20  ;;  %v3634_v27 = vld [vmem:[%s5595_s3 + $0x70] sm:$0xf0]  ;;  %v2820_v30 = vld [vmem:[%s5595_s3 + $0x3c] sm:$0xf0] }
  0x31   : > { %v2835_v28 = vor.u32 %v3629_v23, %v2832_v24  ;;  %v3626_v29 = vld [vmem:[%s5595_s3 + $0x34] sm:$0xf]  ;;  %v2851_v31 = vor.u32 %v3634_v27, %v2850_v26  ;;  %v2838_v32 = vld [vmem:[%s5595_s3 + $0x50] sm:$0xf]  ;;  %v3631_v33 = vld [vmem:[%s5595_s3 + $0x58] sm:$0xf0] }
  0x32   : > { %705 = vmatpush.bf16.msra.mxu0 %v2723_v39  ;;  %v2823_v34 = vor.u32 %v3626_v29, %v2820_v30  ;;  %v2839_v35 = vor.u32 %v3631_v33, %v2838_v32  ;;  %v2826_v36 = vld [vmem:[%s5595_s3 + $0x38] sm:$0xf]  ;;  %v3628_v37 = vld [vmem:[%s5595_s3 + $0x40] sm:$0xf0]  ;;  %v3623_v41 = vld [vmem:[%s5595_s3 + $0x1c] sm:$0xf] }
  0x33   : > { %v2827_v38 = vor.u32 %v3628_v37, %v2826_v36  ;;  %v2806_v39 = vld [vmem:[%s5595_s3 + $0x18] sm:$0xf]  ;;  %v3624_v40 = vld [vmem:[%s5595_s3 + $0x20] sm:$0xf0]  ;;  %v2808_v43 = vld [vmem:[%s5595_s3 + $0x24] sm:$0xf0] }
  0x34   : > { %718 = vmatpush.bf16.msra.mxu1 %v2727_v54  ;;  %917 = vmatpush.bf16.msra.mxu3 %v2831_v60  ;;  %v2807_v42 = vor.u32 %v3624_v40, %v2806_v39  ;;  %v2814_v44 = vld [vmem:[%s5595_s3 + $0x20] sm:$0xf]  ;;  %v3625_v45 = vld [vmem:[%s5595_s3 + $0x28] sm:$0xf0]  ;;  %v2811_v46 = vor.u32 %v3623_v41, %v2808_v43  ;;  %v3620_v50 = vld [vmem:[%s5595_s3 + $0x4] sm:$0xf] }
  0x35   : > { %v2815_v47 = vor.u32 %v3625_v45, %v2814_v44  ;;  %v3621_v49 = vld [vmem:[%s5595_s3 + $0x8] sm:$0xf0]  ;;  %v2796_v52 = vld [vmem:[%s5595_s3 + $0xc] sm:$0xf0]  ;;  %v2802_v53 = vld [vmem:[%s5595_s3 + $0x8] sm:$0xf] }
  0x36   : > { %706 = vmatpush.bf16.msra.mxu0 %v2711_v48  ;;  %v2794_v48 = vld [vmem:[%s5595_s3] sm:$0xf]  ;;  %v3622_v54 = vld [vmem:[%s5595_s3 + $0x10] sm:$0xf0]  ;;  %v2799_v55 = vor.u32 %v3620_v50, %v2796_v52  ;;  %v2790_v57 = vld [vmem:[%s5630_s1 + $0xb0] sm:$0xf] }
  0x37   : > { %v2795_v51 = vor.u32 %v3621_v49, %v2794_v48  ;;  %v2803_v56 = vor.u32 %v3622_v54, %v2802_v53  ;;  %v3619_v58 = vld [vmem:[%s5630_s1 + $0xb8] sm:$0xf0]  ;;  %v2766_v63 = vld [vmem:[%s5630_s1 + $0x80] sm:$0xf]  ;;  %v2754_v2 = vld [vmem:[%s5630_s1 + $0x68] sm:$0xf] }
  0x38   : > { %719 = vmatpush.bf16.msra.mxu1 %v2715_v0  ;;  %918 = vmatpush.bf16.msra.mxu3 %v2819_v8  ;;  %v2791_v60 = vor.u32 %v3619_v58, %v2790_v57  ;;  %v3613_v0 = vld [vmem:[%s5630_s1 + $0x88] sm:$0xf0]  ;;  %v3610_v3 = vld [vmem:[%s5630_s1 + $0x70] sm:$0xf0]  ;;  %v2742_v6 = vld [vmem:[%s5630_s1 + $0x50] sm:$0xf] }
  0x39   : > { %v2767_v1 = vor.u32 %v3613_v0, %v2766_v63  ;;  %v2755_v4 = vor.u32 %v3610_v3, %v2754_v2  ;;  %v3607_v7 = vld [vmem:[%s5630_s1 + $0x58] sm:$0xf0]  ;;  %v4363_v11 = vld [vmem:[%s5594_s2] sm:$0x7]  ;;  %v3601_v14 = vld [vmem:[%s5630_s1 + $0x28] sm:$0xf0] }
  0x3a   : > { %707 = vmatpush.bf16.msra.mxu0 %v2699_v59  ;;  %v2778_v59 = vld [vmem:[%s5630_s1 + $0x98] sm:$0xf]  ;;  %726 = vmatpush.bf16.msra.mxu2 %v2791_v60  ;;  %v2743_v8 = vor.u32 %v3607_v7, %v2742_v6  ;;  %v566_v15 = vperm.slane %v4363_v11, 0  ;;  %v3598_v20 = vld [vmem:[%s5630_s1 + $0x10] sm:$0xf0]  ;;  %v3648_v30 = vld [vmem:[%s5597_s5 + $0x20] sm:$0xff] }
  0x3b   : > { %v3651_v24 = vld [vmem:[%s5597_s5 + $0x38] sm:$0xff]  ;;  %v3650_v27 = vld [vmem:[%s5597_s5 + $0x30] sm:$0xff]  ;;  %v3645_v32 = vld [vmem:[%s5597_s5 + $0x8] sm:$0xff]  ;;  %p526_p11 = scmp.lt.s32.totalorder %s525_s24, 5  ;;  %v3941_v36 = vmov 0.0   ;;  %s5634_s30 = sand.u32 1, %s3931_s22  }
  0x3c   : > { %720 = vmatpush.bf16.msra.mxu1 %v2703_v10  ;;  %919 = vmatpush.bf16.msra.mxu3 %v2807_v42  ;;  %v3604_v10 = vld [vmem:[%s5630_s1 + $0x40] sm:$0xf0]  ;;  %v3675_v39 = vld [vmem:[%s5599_s7 + $0xb8] sm:$0xf0]  ;;  %v3670_v41 = vld [vmem:[%s5599_s7 + $0x94] sm:$0xf] }
  0x3d   : > { %708 = vmatmul.bf16.vlgmr.msra.gmra.mxu0 %v4224_v5  ;;  %v3644_v33 = vld [vmem:[%s5597_s5] sm:$0xff]  ;;  %s5645_s24 = smov (!%p526_p11, %s525_s24), 5  ;;  %v3002_v43 = vld [vmem:[%s5599_s7 + $0x98] sm:$0xf]  ;;  %v2984_v48 = vld [vmem:[%s5599_s7 + $0x84] sm:$0xf0] }
  0x3e   : > { %926 = vmatpush.bf16.msrb.mxu0 %v2883_v61  ;;  %v3616_v61 = vld [vmem:[%s5630_s1 + $0xa0] sm:$0xf0]  ;;  %s2695_s21 = sshll.u32 %s5645_s24, 3  ;;  %v2996_v42 = vld [vmem:[%s5599_s7 + $0x9c] sm:$0xf0]  ;;  %s3593_s24 = sshll.u32 %s4048_s25, 3 }
  0x3f   : > { %721 = vmatmul.bf16.vlgmr.msra.gmra.mxu1 %v4224_v5  ;;  %v2779_v62 = vor.u32 %v3616_v61, %v2778_v59  ;;  %s4409_s17 = scalar_lea.vmem %s5608_s16, %s2695_s21  ;;  %v2999_v44 = vor.u32 %v3670_v41, %v2996_v42  ;;  %v3672_v45 = vld [vmem:[%s5599_s7 + $0xa0] sm:$0xf0]  ;;  %v2990_v49 = vld [vmem:[%s5599_s7 + $0x80] sm:$0xf]  ;;  %v3669_v50 = vld [vmem:[%s5599_s7 + $0x88] sm:$0xf0]  ;;  %s2596_s27 = scalar_lea.hbm %s5607_s15, %s3593_s24 }
  0x40   : > { %939 = vmatpush.bf16.msrb.mxu1 %v2887_v13  ;;  %920 = vmatpush.bf16.msra.mxu3 %v2795_v51  ;;  %v2718_v13 = vld [vmem:[%s5630_s1 + $0x20] sm:$0xf]  ;;  %2579 = vst [vmem:[%s4409_s17 + $0x16] sm:$0x3] %v3941_v36  ;;  %v2991_v52 = vor.u32 %v3669_v50, %v2990_v49  ;;  %v3664_v53 = vld [vmem:[%s5599_s7 + $0x64] sm:$0xf] }
  0x41   : > { %727 = vmatpush.bf16.msra.mxu2 %v2779_v62  ;;  %v2972_v54 = vld [vmem:[%s5599_s7 + $0x6c] sm:$0xf0]  ;;  %v3666_v57 = vld [vmem:[%s5599_s7 + $0x70] sm:$0xf0]  ;;  %v3006_v59 = vld [vmem:[%s5599_s7 + $0xa8] sm:$0xf] }
  0x42   : > { %927 = vmatpush.bf16.msrb.mxu0 %v2871_v9  ;;  %v2730_v9 = vld [vmem:[%s5630_s1 + $0x38] sm:$0xf]  ;;  %v3674_v60 = vld [vmem:[%s5599_s7 + $0xb0] sm:$0xf0]  ;;  %v4473_v61 = vld [vmem:[%s5596_s4] sm:$0x7]  ;;  %v2975_v62 = vor.u32 %v3664_v53, %v2972_v54 }
  0x43   : > { %v2731_v12 = vor.u32 %v3604_v10, %v2730_v9  ;;  %v3007_v63 = vor.u32 %v3674_v60, %v3006_v59  ;;  %v779_v0 = vperm.slane %v4473_v61, 0  ;;  %v3661_v2 = vld [vmem:[%s5599_s7 + $0x4c] sm:$0xf]  ;;  %v2960_v3 = vld [vmem:[%s5599_s7 + $0x54] sm:$0xf0]  ;;  %s2600_s0 = sshll.u32 %s2596_s27, 4  ;;  %s2601_s0 = int_to_ptr.hbm [resolvable:$true] %s2600_s0 }
  0x44   : > { %940 = vmatpush.bf16.msrb.mxu1 %v2875_v19  ;;  %v2706_v19 = vld [vmem:[%s5630_s1 + $0x8] sm:$0xf]  ;;  %v3663_v6 = vld [vmem:[%s5599_s7 + $0x58] sm:$0xf0]  ;;  %v2994_v7 = vld [vmem:[%s5599_s7 + $0x90] sm:$0xf]  ;;  %v2963_v10 = vor.u32 %v3661_v2, %v2960_v3 }
  0x45   : > { %728 = vmatpush.bf16.msra.mxu2 %v2767_v1  ;;  %1207 = vmatpush.bf16.msrb.mxu3 %v3007_v63  ;;  %v2942_v36 = vld [vmem:[%s5599_s7 + $0x20] sm:$0xf]  ;;  %v2958_v41 = vld [vmem:[%s5599_s7 + $0x48] sm:$0xf]  ;;  %v3662_v42 = vld [vmem:[%s5599_s7 + $0x50] sm:$0xf0] }
  0x46   : > { %928 = vmatpush.bf16.msrb.mxu0 %v2859_v16  ;;  %v2719_v16 = vor.u32 %v3601_v14, %v2718_v13  ;;  %v3707_v53 = vld [vmem:[%s5603_s11 + $0x74] sm:$0xf0]  ;;  %v3202_v54 = vld [vmem:[%s5603_s11 + $0xf0] sm:$0xf]  ;;  %v3659_v63 = vld [vmem:[%s5599_s7 + $0x38] sm:$0xf0] }
  0x47   : > { %s2581_s26 = scalar_lea.sflag [#allocation3], %s5634_s30  ;;  %s3891_s23 = sshra.s32 %s2601_s0, 4  ;;  %s3892_s23 = int_to_ptr.hbm [resolvable:$true] %s3891_s23 }
  0x48   : > { %941 = vmatpush.bf16.msrb.mxu1 %v2863_v25  ;;  %s3893_s1 = scalar_lea.hbm %s3892_s23, 8  ;;  %s3897_s24 = scalar_lea.hbm %s5607_s15, 16 }
  0x49   : > { %729 = vmatpush.bf16.msra.mxu2 %v2755_v4  ;;  %v2966_v4 = vld [vmem:[%s5599_s7 + $0x50] sm:$0xf]  ;;  %p3894_p12 = scmp.ne.s32.totalorder %s3892_s23, %s3893_s1  ;;  %p3898_p1 = scmp.lt.s32.totalorder %s3892_s23, %s5607_s15 }
  0x4a   : > { %929 = vmatpush.bf16.msrb.mxu0 %v2847_v22  ;;  %v2707_v22 = vor.u32 %v3598_v20, %v2706_v19  ;;  %v2954_v20 = vld [vmem:[%s5599_s7 + $0x38] sm:$0xf]  ;;  %p3899_p2 = scmp.lt.s32.totalorder %s3897_s24, %s3893_s1 }
  0x4b   : > { %p3895_p13 = pnand %p3894_p12, %p4065_p5 }
  0x4c   : > { %942 = vmatpush.bf16.msrb.mxu1 %v2851_v31  ;;  %v3647_v31 = vld [vmem:[%s5597_s5 + $0x18] sm:$0xff]  ;;  %p3900_p3 = por %p3899_p2, %p3898_p1 }
  0x4d   : > { %730 = vmatpush.bf16.msra.mxu2 %v2743_v8  ;;  %v3671_v8 = vld [vmem:[%s5599_s7 + $0x98] sm:$0xf0]  ;;  %p3896_p0 = pneg %p3895_p13 }
  0x4e   : > { %930 = vmatpush.bf16.msrb.mxu0 %v2835_v28  ;;  %v3649_v28 = vld [vmem:[%s5597_s5 + $0x28] sm:$0xff]  ;;  %v2995_v13 = vor.u32 %v3671_v8, %v2994_v7  ;;  %v3130_v7 = vld [vmem:[%s5603_s11 + $0x60] sm:$0xf] }
  0x4f   : > { %p3901_p4 = pnand %p3900_p3, %p3896_p0 }
  0x50   : > { %943 = vmatpush.bf16.msrb.mxu1 %v2839_v35  ;;  %v3008_v35 = vld [vmem:[%s5599_s7 + $0xb4] sm:$0xf0]  ;;  %1208 = vmatpush.bf16.msrb.mxu3 %v2995_v13 }
  0x51   : > { %731 = vmatpush.bf16.msra.mxu2 %v2731_v12  ;;  %v3658_v12 = vld [vmem:[%s5599_s7 + $0x34] sm:$0xf] }
  0x52   : > { %931 = vmatpush.bf16.msrb.mxu0 %v2823_v34  ;;  %v3673_v34 = vld [vmem:[%s5599_s7 + $0xac] sm:$0xf] }
  0x53   : > { %v3011_v37 = vor.u32 %v3673_v34, %v3008_v35  ;;  %v3655_v34 = vld [vmem:[%s5599_s7 + $0x1c] sm:$0xf]  ;;  %v2936_v35 = vld [vmem:[%s5599_s7 + $0x24] sm:$0xf0] }
  0x54   : > { %944 = vmatpush.bf16.msrb.mxu1 %v2827_v38  ;;  %v3014_v38 = vld [vmem:[%s5599_s7 + $0xb0] sm:$0xf] }
  0x55   : > { %732 = vmatpush.bf16.msra.mxu2 %v2719_v16  ;;  %v3015_v40 = vor.u32 %v3675_v39, %v3014_v38  ;;  %v2948_v16 = vld [vmem:[%s5599_s7 + $0x3c] sm:$0xf0] }
  0x56   : > { %932 = vmatpush.bf16.msrb.mxu0 %v2811_v46  ;;  %v3003_v46 = vor.u32 %v3672_v45, %v3002_v43  ;;  %v3652_v45 = vld [vmem:[%s5599_s7 + $0x4] sm:$0xf] }
  0x58   : > { %945 = vmatpush.bf16.msrb.mxu1 %v2815_v47  ;;  %v3667_v47 = vld [vmem:[%s5599_s7 + $0x7c] sm:$0xf] }
  0x59   : > { %733 = vmatpush.bf16.msra.mxu2 %v2707_v22  ;;  %v2987_v51 = vor.u32 %v3667_v47, %v2984_v48  ;;  %v2930_v47 = vld [vmem:[%s5599_s7 + $0x8] sm:$0xf] }
  0x5a   : > { %933 = vmatpush.bf16.msrb.mxu0 %v2799_v55 }
  0x5c   : > { %946 = vmatpush.bf16.msrb.mxu1 %v2803_v56  ;;  %734 = vmatmul.bf16.vlgmr.msra.gmra.mxu2 %v4224_v5  ;;  %v3646_v5 = vld [vmem:[%s5597_s5 + $0x10] sm:$0xff]  ;;  %v2978_v56 = vld [vmem:[%s5599_s7 + $0x68] sm:$0xf] }
  0x5d   : > { %1025 = vmatpush.bf16.msrb.mxu2 %v3651_v24  ;;  %v2979_v1 = vor.u32 %v3666_v57, %v2978_v56  ;;  %v3723_v56 = vld [vmem:[%s5603_s11 + $0xf4] sm:$0xf0]  ;;  %v2959_v57 = vor.u32 %v3662_v42, %v2958_v41  ;;  %v3697_v41 = vld [vmem:[%s5603_s11 + $0x24] sm:$0xf0]  ;;  %v3162_v42 = vld [vmem:[%s5603_s11 + $0xa0] sm:$0xf] }
  0x5e   : > { %1220 = vmatpush.bf16.msra.mxu0 %v3011_v37  ;;  %v3657_v37 = vld [vmem:[%s5599_s7 + $0x28] sm:$0xf0]  ;;  %v3203_v8 = vor.u32 %v3723_v56, %v3202_v54  ;;  %v3082_v56 = vld [vmem:[%s5603_s11] sm:$0xf] }
  0x5f   : > { %v2943_v50 = vor.u32 %v3657_v37, %v2942_v36  ;;  %v3170_v36 = vld [vmem:[%s5603_s11 + $0xb0] sm:$0xf]  ;;  %v3715_v37 = vld [vmem:[%s5603_s11 + $0xb4] sm:$0xf0] }
  0x60   : > { %1233 = vmatpush.bf16.msra.mxu1 %v3015_v40 }
  0x61   : > { %1026 = vmatpush.bf16.msrb.mxu2 %v3650_v27 }
  0x62   : > { %1221 = vmatpush.bf16.msra.mxu0 %v2999_v44  ;;  %v2939_v44 = vor.u32 %v3655_v34, %v2936_v35  ;;  %v3106_v34 = vld [vmem:[%s5603_s11 + $0x30] sm:$0xf]  ;;  %v3699_v35 = vld [vmem:[%s5603_s11 + $0x34] sm:$0xf0] }
  0x64   : > { %1234 = vmatpush.bf16.msra.mxu1 %v3003_v46  ;;  %v2924_v46 = vld [vmem:[%s5599_s7 + $0xc] sm:$0xf0] }
  0x65   : > { %1027 = vmatpush.bf16.msrb.mxu2 %v3649_v28  ;;  %v2970_v28 = vld [vmem:[%s5599_s7 + $0x60] sm:$0xf] }
  0x66   : > { %1222 = vmatpush.bf16.msra.mxu0 %v2987_v51  ;;  %v3654_v51 = vld [vmem:[%s5599_s7 + $0x10] sm:$0xf0] }
  0x68   : > { %1235 = vmatpush.bf16.msra.mxu1 %v2991_v52  ;;  %v3138_v52 = vld [vmem:[%s5603_s11 + $0x70] sm:$0xf] }
  0x69   : > { %1028 = vmatpush.bf16.msrb.mxu2 %v3648_v30  ;;  %v2951_v30 = vor.u32 %v3658_v12, %v2948_v16  ;;  %v3721_v12 = vld [vmem:[%s5603_s11 + $0xe4] sm:$0xf0]  ;;  %v2934_v16 = vld [vmem:[%s5599_s7 + $0x18] sm:$0xf] }
  0x6a   : > { %1223 = vmatpush.bf16.msra.mxu0 %v2975_v62  ;;  %v2946_v62 = vld [vmem:[%s5599_s7 + $0x30] sm:$0xf] }
  0x6b   : > { %v2947_v13 = vor.u32 %v3659_v63, %v2946_v62  ;;  %v3709_v62 = vld [vmem:[%s5603_s11 + $0x84] sm:$0xf0] }
  0x6c   : > { %1236 = vmatpush.bf16.msra.mxu1 %v2979_v1 }
  0x6d   : > { %1029 = vmatpush.bf16.msrb.mxu2 %v3647_v31 }
  0x6e   : > { %1224 = vmatpush.bf16.msra.mxu0 %v2963_v10  ;;  %v3194_v10 = vld [vmem:[%s5603_s11 + $0xe0] sm:$0xf] }
  0x71   : > { %1030 = vmatpush.bf16.msrb.mxu2 %v3646_v5 }
  0x72   : > { %1225 = vmatpush.bf16.msra.mxu0 %v2951_v30  ;;  %v3178_v30 = vld [vmem:[%s5603_s11 + $0xc0] sm:$0xf] }
  0x75   : > { %1031 = vmatpush.bf16.msrb.mxu2 %v3645_v32 }
  0x76   : > { %1226 = vmatpush.bf16.msra.mxu0 %v2939_v44 }
  0x79   : > { %1032 = vmatpush.bf16.msrb.mxu2 %v3644_v33 }
  0xba   : > { %v709_v17 = vpop.f32.mrf.mxu0 }
  0xbb   : > { %v710_v18 = vadd.f32 %v709_v17, %v566_v15  ;;  %v2967_v15 = vor.u32 %v3663_v6, %v2966_v4  ;;  %v2982_v17 = vld [vmem:[%s5599_s7 + $0x78] sm:$0xf]  ;;  %v2931_v4 = vor.u32 %v3654_v51, %v2930_v47  ;;  %v3139_v6 = vor.u32 %v3707_v53, %v3138_v52  ;;  %v2922_v51 = vld [vmem:[%s5599_s7] sm:$0xf]  ;;  %v3653_v52 = vld [vmem:[%s5599_s7 + $0x8] sm:$0xf0] }
  0xbc   : > { %v4381_v25 = vpop.f32.mrf.mxu1  ;;  %v3695_v47 = vld [vmem:[%s5603_s11 + $0x14] sm:$0xf0]  ;;  %v2923_v54 = vor.u32 %v3653_v52, %v2922_v51 }
  0xbd   : > { %v739_v21 = vmax.f32 %v710_v18, 0.0  ;;  %v3668_v18 = vld [vmem:[%s5599_s7 + $0x80] sm:$0xf0]  ;;  %1237 = vmatpush.bf16.msra.mxu1 %v2967_v15 }
  0xbe   : > { %v2983_v22 = vor.u32 %v3668_v18, %v2982_v17  ;;  %v3656_v17 = vld [vmem:[%s5599_s7 + $0x20] sm:$0xf0] }
  0xbf   : > { %v744_v23 = vpack.c.bf16 %v739_v21, %v739_v21  ;;  %v3660_v21 = vld [vmem:[%s5599_s7 + $0x40] sm:$0xf0] }
  0xc0   : > { %v2955_v33 = vor.u32 %v3660_v21, %v2954_v20  ;;  %1209 = vmatpush.bf16.msrb.mxu3 %v2983_v22  ;;  %v3122_v20 = vld [vmem:[%s5603_s11 + $0x50] sm:$0xf]  ;;  %v3703_v21 = vld [vmem:[%s5603_s11 + $0x54] sm:$0xf0]  ;;  %v2935_v22 = vor.u32 %v3656_v17, %v2934_v16  ;;  %v3753_v16 = vld [vmem:[%s5605_s13 + $0xe4] sm:$0xf0] }
  0xc1   : > { %921 = vmatmul.bf16.vlgmr.msra.gmra.mxu3 %v744_v23  ;;  %934 = vmatmul.bf16.vlgmr.msrb.gmra.mxu0 %v744_v23  ;;  %v567_v17 = vperm.slane %v4363_v11, 1 }
  0xc2   : > { %947 = vmatmul.bf16.vlgmr.msrb.gmra.mxu1 %v744_v23  ;;  %v711_v26 = vpop.f32.mrf.mxu0 }
  0xc3   : > { %1238 = vmatpush.bf16.msra.mxu1 %v2955_v33 }
  0xc4   : > { %v724_v29 = vpop.f32.mrf.mxu1 }
  0xc5   : > { %v3665_v29 = vld [vmem:[%s5599_s7 + $0x68] sm:$0xf0] }
  0xc6   : > { %v2971_v38 = vor.u32 %v3665_v29, %v2970_v28  ;;  %v3114_v28 = vld [vmem:[%s5603_s11 + $0x40] sm:$0xf]  ;;  %v3701_v29 = vld [vmem:[%s5603_s11 + $0x44] sm:$0xf0] }
  0xc7   : > { %1239 = vmatpush.bf16.msra.mxu1 %v2943_v50  ;;  %v3711_v50 = vld [vmem:[%s5603_s11 + $0x94] sm:$0xf0] }
  0xc8   : > { %1210 = vmatpush.bf16.msrb.mxu3 %v2971_v38  ;;  %v3107_v38 = vor.u32 %v3699_v35, %v3106_v34  ;;  %v3688_v34 = vld [vmem:[%s5601_s9 + $0x64] sm:$0xf]  ;;  %v3068_v35 = vld [vmem:[%s5601_s9 + $0x68] sm:$0xf0] }
  0xcb   : > { %1240 = vmatpush.bf16.msra.mxu1 %v2931_v4  ;;  %v3330_v4 = vld [vmem:[%s5605_s13 + $0xf0] sm:$0xf] }
  0xcc   : > { %1211 = vmatpush.bf16.msrb.mxu3 %v2959_v57  ;;  %v3693_v57 = vld [vmem:[%s5603_s11 + $0x4] sm:$0xf0] }
  0xcf   : > { %1595 = vmatpush.bf16.msrb.mxu1 %v3203_v8 }
  0xd0   : > { %1212 = vmatpush.bf16.msrb.mxu3 %v2947_v13  ;;  %v3737_v13 = vld [vmem:[%s5605_s13 + $0x64] sm:$0xf0] }
  0xd4   : > { %1213 = vmatpush.bf16.msrb.mxu3 %v2935_v22  ;;  %v3314_v22 = vld [vmem:[%s5605_s13 + $0xd0] sm:$0xf] }
  0xd8   : > { %1214 = vmatpush.bf16.msrb.mxu3 %v2923_v54  ;;  %v3685_v54 = vld [vmem:[%s5601_s9 + $0x44] sm:$0xf0] }
  0xdf   : > { %v4525_v31 = vpop.f32.mrf.mxu2 }
  0xe7   : > { %v737_v1 = vpop.f32.mrf.mxu2 }
  0xe8   : > { %v3266_v1 = vld [vmem:[%s5605_s13 + $0x70] sm:$0xf] }
 0x13e   : > { %v4454_v55 = vpop.f32.mrf.mxu0 }
 0x13f   : > { %v4462_v58 = vpop.f32.mrf.mxu1 }
 0x144   : > { %v922_v9 = vpop.f32.mrf.mxu3 }
 0x145   : > { %v4497_v14 = vadd.f32 %v922_v9, %v779_v0  ;;  %v2927_v0 = vor.u32 %v3652_v45, %v2924_v46  ;;  %v3705_v9 = vld [vmem:[%s5603_s11 + $0x64] sm:$0xf0]  ;;  %v3090_v46 = vld [vmem:[%s5603_s11 + $0x10] sm:$0xf] }
 0x146   : > { %v937_v19 = vpop.f32.mrf.mxu0  ;;  %v3131_v18 = vor.u32 %v3705_v9, %v3130_v7 }
 0x147   : > { %v2564_v23 = vrot.slane %v4497_v14, 4  ;;  %v2571_v24 = vmul.f32 %v4497_v14, %v4497_v14  ;;  %v950_v26 = vpop.f32.mrf.mxu1  ;;  %v956_v27 = vpack.c.bf16 %v4497_v14, %v4497_v14  ;;  %1227 = vmatpush.bf16.msra.mxu0 %v2927_v0  ;;  %v3195_v19 = vor.u32 %v3721_v12, %v3194_v10  ;;  %v3860_v0 = vld [vmem:[%s5598_s6] ss:$0 sm:$0xff] }
 0x148   : > { %v3123_v26 = vor.u32 %v3703_v21, %v3122_v20  ;;  %v3258_v12 = vld [vmem:[%s5605_s13 + $0x60] sm:$0xf]  ;;  %v3735_v20 = vld [vmem:[%s5605_s13 + $0x54] sm:$0xf0] }
 0x149   : > { %v2565_v5 = vadd.f32 %v2564_v23, %v4497_v14  ;;  %v2572_v32 = vrot.slane %v2571_v24, 4  ;;  %1033 = vmatmul.bf16.vlgmr.msrb.gmra.mxu2 %v956_v27  ;;  %v3186_v23 = vld [vmem:[%s5603_s11 + $0xd0] sm:$0xf]  ;;  %1596 = vmatpush.bf16.msrb.mxu1 %v3195_v19  ;;  %v3259_v21 = vor.u32 %v3737_v13, %v3258_v12 }
 0x14a   : > { %v3250_v19 = vld [vmem:[%s5605_s13 + $0x50] sm:$0xf] }
 0x14b   : > { %v2566_v39 = vrot.slane %v2565_v5, 2  ;;  %v2573_v40 = vadd.f32 %v2572_v32, %v2571_v24  ;;  %1582 = vmatpush.bf16.msrb.mxu0 %v3139_v6  ;;  %v3719_v24 = vld [vmem:[%s5603_s11 + $0xd4] sm:$0xf0]  ;;  %v3115_v32 = vor.u32 %v3701_v29, %v3114_v28  ;;  %v3076_v28 = vld [vmem:[%s5601_s9 + $0x78] sm:$0xf0] }
 0x14c   : > { %v924_v43 = vpop.f32.mrf.mxu3  ;;  %v3187_v27 = vor.u32 %v3719_v24, %v3186_v23  ;;  %v3755_v6 = vld [vmem:[%s5605_s13 + $0xf4] sm:$0xf0]  ;;  %v3690_v24 = vld [vmem:[%s5601_s9 + $0x74] sm:$0xf]  ;;  %v3066_v29 = vld [vmem:[%s5601_s9 + $0x60] sm:$0xf] }
 0x14d   : > { %v2567_v48 = vadd.f32 %v2566_v39, %v2565_v5  ;;  %v2574_v49 = vrot.slane %v2573_v40, 2  ;;  %v3717_v5 = vld [vmem:[%s5603_s11 + $0xc4] sm:$0xf0]  ;;  %v3171_v39 = vor.u32 %v3715_v37, %v3170_v36  ;;  %v3331_v10 = vor.u32 %v3755_v6, %v3330_v4  ;;  %v3691_v23 = vld [vmem:[%s5601_s9 + $0x74] sm:$0xf0] }
 0x14e   : > { %1597 = vmatpush.bf16.msrb.mxu1 %v3187_v27  ;;  %v3179_v33 = vor.u32 %v3717_v5, %v3178_v30  ;;  %v3713_v43 = vld [vmem:[%s5603_s11 + $0xa4] sm:$0xf0]  ;;  %v723_v36 = vadd.f32 %v4381_v25, %v567_v17  ;;  %v3687_v25 = vld [vmem:[%s5601_s9 + $0x54] sm:$0xf0]  ;;  %v3042_v4 = vld [vmem:[%s5601_s9 + $0x30] sm:$0xf] }
 0x14f   : > { %v2568_v59 = vrot.slane %v2567_v48, 1  ;;  %v2575_v60 = vadd.f32 %v2574_v49, %v2573_v40  ;;  %1583 = vmatpush.bf16.msrb.mxu0 %v3131_v18  ;;  %v3098_v40 = vld [vmem:[%s5603_s11 + $0x20] sm:$0xf]  ;;  %v3163_v45 = vor.u32 %v3713_v43, %v3162_v42  ;;  %v3091_v49 = vor.u32 %v3695_v47, %v3090_v46  ;;  %v3689_v30 = vld [vmem:[%s5601_s9 + $0x64] sm:$0xf0] }
 0x150   : > { %v3099_v44 = vor.u32 %v3697_v41, %v3098_v40  ;;  %v568_v18 = vperm.slane %v4363_v11, 2  ;;  %v3074_v11 = vld [vmem:[%s5601_s9 + $0x70] sm:$0xf]  ;;  %v3067_v37 = vor.u32 %v3689_v30, %v3066_v29  ;;  %v3242_v40 = vld [vmem:[%s5605_s13 + $0x40] sm:$0xf]  ;;  %v3071_v41 = vor.u32 %v3688_v34, %v3068_v35 }
 0x151   : > { %v2569_v2 = vadd.f32 %v2568_v59, %v2567_v48  ;;  %v2576_v3 = vrot.slane %v2575_v60, 1  ;;  %v3154_v48 = vld [vmem:[%s5603_s11 + $0x90] sm:$0xf]  ;;  %v3146_v59 = vld [vmem:[%s5603_s11 + $0x80] sm:$0xf]  ;;  %v3075_v27 = vor.u32 %v3691_v23, %v3074_v11 }
 0x152   : > { %1598 = vmatpush.bf16.msrb.mxu1 %v3179_v33  ;;  %v3155_v53 = vor.u32 %v3711_v50, %v3154_v48  ;;  %v3147_v63 = vor.u32 %v3709_v62, %v3146_v59  ;;  %v3079_v33 = vor.u32 %v3690_v24, %v3076_v28  ;;  %v3058_v42 = vld [vmem:[%s5601_s9 + $0x50] sm:$0xf]  ;;  %v3306_v46 = vld [vmem:[%s5605_s13 + $0xc0] sm:$0xf]  ;;  %v3749_v47 = vld [vmem:[%s5605_s13 + $0xc4] sm:$0xf0] }
 0x153   : > { %2570 = vst [vmem:[%s4409_s17 + $0x14] sm:$0x1] %v2569_v2  ;;  %v2577_v15 = vadd.f32 %v2576_v3, %v2575_v60  ;;  %1584 = vmatpush.bf16.msrb.mxu0 %v3123_v26  ;;  %v3083_v60 = vor.u32 %v3693_v57, %v3082_v56  ;;  %v3739_v2 = vld [vmem:[%s5605_s13 + $0x74] sm:$0xf0]  ;;  %1354 = vmatpush.bf16.msra.mxu2 %v3075_v27  ;;  %v740_v48 = vmax.f32 %v723_v36, 0.0 }
 0x154   : > { %v3267_v8 = vor.u32 %v3739_v2, %v3266_v1  ;;  %1367 = vmatpush.bf16.msra.mxu3 %v3079_v33  ;;  %v3307_v56 = vor.u32 %v3749_v47, %v3306_v46  ;;  %v3234_v57 = vld [vmem:[%s5605_s13 + $0x30] sm:$0xf]  ;;  %v3731_v59 = vld [vmem:[%s5605_s13 + $0x34] sm:$0xf0]  ;;  %v3044_v17 = vld [vmem:[%s5601_s9 + $0x38] sm:$0xf0] }
 0x155   : > { %2578 = vst [vmem:[%s4409_s17 + $0x15] sm:$0x1] %v2577_v15  ;;  %v3322_v15 = vld [vmem:[%s5605_s13 + $0xe0] sm:$0xf]  ;;  %v3747_v62 = vld [vmem:[%s5605_s13 + $0xb4] sm:$0xf0]  ;;  %v4789_v1 = vpack.c.bf16 %v740_v48, %v740_v48 }
 0x156   : > { %1599 = vmatpush.bf16.msrb.mxu1 %v3171_v39  ;;  %v3323_v26 = vor.u32 %v3753_v16, %v3322_v15  ;;  %v3251_v39 = vor.u32 %v3735_v20, %v3250_v19  ;;  %v3683_v6 = vld [vmem:[%s5601_s9 + $0x34] sm:$0xf0]  ;;  %v3745_v15 = vld [vmem:[%s5605_s13 + $0xa4] sm:$0xf0]  ;;  %v3682_v16 = vld [vmem:[%s5601_s9 + $0x34] sm:$0xf] }
 0x157   : > { %1585 = vmatpush.bf16.msrb.mxu0 %v3115_v32  ;;  %v3751_v32 = vld [vmem:[%s5605_s13 + $0xd4] sm:$0xf0]  ;;  %1355 = vmatpush.bf16.msra.mxu2 %v3067_v37  ;;  %v780_v19 = vperm.slane %v4473_v61, 1  ;;  %v781_v20 = vperm.slane %v4473_v61, 2  ;;  %v3681_v11 = vld [vmem:[%s5601_s9 + $0x24] sm:$0xf0]  ;;  %v3047_v27 = vor.u32 %v3682_v16, %v3044_v17 }
 0x158   : > { %v3315_v43 = vor.u32 %v3751_v32, %v3314_v22  ;;  %1368 = vmatpush.bf16.msra.mxu3 %v3071_v41  ;;  %v3034_v22 = vld [vmem:[%s5601_s9 + $0x20] sm:$0xf]  ;;  %v3218_v24 = vld [vmem:[%s5605_s13 + $0x10] sm:$0xf]  ;;  %v3727_v61 = vld [vmem:[%s5605_s13 + $0x14] sm:$0xf0] }
 0x159   : > { %v3743_v28 = vld [vmem:[%s5605_s13 + $0x94] sm:$0xf0]  ;;  %v3680_v29 = vld [vmem:[%s5601_s9 + $0x24] sm:$0xf]  ;;  %v3036_v30 = vld [vmem:[%s5601_s9 + $0x28] sm:$0xf0]  ;;  %v936_v32 = vadd.f32 %v4454_v55, %v780_v19  ;;  %v3219_v33 = vor.u32 %v3727_v61, %v3218_v24  ;;  %v949_v37 = vadd.f32 %v4462_v58, %v781_v20 }
 0x15a   : > { %1600 = vmatpush.bf16.msrb.mxu1 %v3163_v45  ;;  %v3060_v45 = vld [vmem:[%s5601_s9 + $0x58] sm:$0xf0]  ;;  %v3210_v34 = vld [vmem:[%s5605_s13] sm:$0xf]  ;;  %v3026_v35 = vld [vmem:[%s5601_s9 + $0x10] sm:$0xf]  ;;  %v3039_v41 = vor.u32 %v3680_v29, %v3036_v30 }
 0x15b   : > { %1586 = vmatpush.bf16.msrb.mxu0 %v3107_v38  ;;  %v736_v38 = vadd.f32 %v4525_v31, %v568_v18  ;;  %v3733_v31 = vld [vmem:[%s5605_s13 + $0x44] sm:$0xf0]  ;;  %v3043_v18 = vor.u32 %v3683_v6, %v3042_v4  ;;  %v3679_v36 = vld [vmem:[%s5601_s9 + $0x14] sm:$0xf0]  ;;  %v3394_v58 = vld [vmem:[%s5605_s13 + $0x70] sm:$0xf] }
 0x15c   : > { %v3243_v51 = vor.u32 %v3733_v31, %v3242_v40  ;;  %v3725_v55 = vld [vmem:[%s5605_s13 + $0x4] sm:$0xf0]  ;;  %v3027_v31 = vor.u32 %v3679_v36, %v3026_v35  ;;  %v3018_v47 = vld [vmem:[%s5601_s9] sm:$0xf]  ;;  %v3722_v6 = vld [vmem:[%s5603_s11 + $0xf4] sm:$0xf] }
 0x15d   : > { %v741_v50 = vmax.f32 %v736_v38, 0.0  ;;  %v3741_v40 = vld [vmem:[%s5605_s13 + $0x84] sm:$0xf0]  ;;  %v3211_v46 = vor.u32 %v3725_v55, %v3210_v34  ;;  %v3767_v19 = vld [vmem:[%s5605_s13 + $0x54] sm:$0xf0] }
 0x15e   : > { %1601 = vmatpush.bf16.msrb.mxu1 %v3155_v53  ;;  %v3050_v53 = vld [vmem:[%s5601_s9 + $0x40] sm:$0xf]  ;;  %v3677_v48 = vld [vmem:[%s5601_s9 + $0x4] sm:$0xf0]  ;;  %v3196_v24 = vld [vmem:[%s5603_s11 + $0xe8] sm:$0xf0] }
 0x15f   : > { %1587 = vmatpush.bf16.msrb.mxu0 %v3099_v44  ;;  %v3686_v44 = vld [vmem:[%s5601_s9 + $0x54] sm:$0xf]  ;;  %v3051_v2 = vor.u32 %v3685_v54, %v3050_v53  ;;  %v4806_v13 = vpack.c.bf16 %v741_v50, %v741_v50  ;;  %v953_v50 = vmax.f32 %v949_v37, 0.0  ;;  %v3140_v54 = vld [vmem:[%s5603_s11 + $0x78] sm:$0xf0] }
 0x160   : > { %v3063_v52 = vor.u32 %v3686_v44, %v3060_v45  ;;  %v3678_v44 = vld [vmem:[%s5601_s9 + $0x14] sm:$0xf]  ;;  %v3028_v45 = vld [vmem:[%s5601_s9 + $0x18] sm:$0xf0]  ;;  %v3370_v29 = vld [vmem:[%s5605_s13 + $0x40] sm:$0xf] }
 0x161   : > { %v3706_v53 = vld [vmem:[%s5603_s11 + $0x74] sm:$0xf]  ;;  %v3765_v30 = vld [vmem:[%s5605_s13 + $0x44] sm:$0xf0]  ;;  %v3188_v36 = vld [vmem:[%s5603_s11 + $0xd8] sm:$0xf0] }
 0x162   : > { %1602 = vmatpush.bf16.msrb.mxu1 %v3147_v63  ;;  %v3684_v63 = vld [vmem:[%s5601_s9 + $0x44] sm:$0xf]  ;;  %1369 = vmatpush.bf16.msra.mxu3 %v3063_v52  ;;  %v3143_v4 = vor.u32 %v3706_v53, %v3140_v54  ;;  %v3718_v35 = vld [vmem:[%s5603_s11 + $0xd4] sm:$0xf]  ;;  %v3371_v37 = vor.u32 %v3765_v30, %v3370_v29  ;;  %v3116_v55 = vld [vmem:[%s5603_s11 + $0x48] sm:$0xf0] }
 0x163   : > { %1588 = vmatpush.bf16.msrb.mxu0 %v3091_v49  ;;  %v3059_v49 = vor.u32 %v3687_v25, %v3058_v42  ;;  %v3771_v42 = vld [vmem:[%s5605_s13 + $0x74] sm:$0xf0]  ;;  %v3458_v25 = vld [vmem:[%s5605_s13 + $0xf0] sm:$0xf]  ;;  %v3777_v53 = vld [vmem:[%s5605_s13 + $0xa4] sm:$0xf0] }
 0x164   : > { %v3395_v52 = vor.u32 %v3771_v42, %v3394_v58  ;;  %v3191_v58 = vor.u32 %v3718_v35, %v3188_v36  ;;  %v3426_v42 = vld [vmem:[%s5605_s13 + $0xb0] sm:$0xf]  ;;  %v3692_v29 = vld [vmem:[%s5603_s11 + $0x4] sm:$0xf]  ;;  %v3084_v30 = vld [vmem:[%s5603_s11 + $0x8] sm:$0xf0] }
 0x165   : > { %1356 = vmatpush.bf16.msra.mxu2 %v3059_v49  ;;  %v952_v49 = vmax.f32 %v936_v32, 0.0  ;;  %v3434_v32 = vld [vmem:[%s5605_s13 + $0xc0] sm:$0xf] }
 0x166   : > { %v1071_v35 = vld [vmem:[%s5600_s8] sm:$0x7] }
 0x167   : > { %1589 = vmatpush.bf16.msrb.mxu0 %v3083_v60  ;;  %v3298_v60 = vld [vmem:[%s5605_s13 + $0xb0] sm:$0xf]  ;;  %v1074_v36 = vperm.slane %v1071_v35, 1 }
 0x169   : > { %1357 = vmatpush.bf16.msra.mxu2 %v3051_v2  ;;  %v3676_v2 = vld [vmem:[%s5601_s9 + $0x4] sm:$0xf] }
 0x16d   : > { %1358 = vmatpush.bf16.msra.mxu2 %v3043_v18  ;;  %v3378_v18 = vld [vmem:[%s5605_s13 + $0x50] sm:$0xf] }
 0x16e   : > { %v3379_v61 = vor.u32 %v3767_v19, %v3378_v18  ;;  %v3338_v18 = vld [vmem:[%s5605_s13] sm:$0xf]  ;;  %v3757_v19 = vld [vmem:[%s5605_s13 + $0x4] sm:$0xf0] }
 0x1cc   : > { %v1034_v3 = vpop.f32.mrf.mxu2 }
 0x1cd   : > { %v1035_v7 = vadd.f32 %v3860_v0, %v1034_v3  ;;  %v3052_v0 = vld [vmem:[%s5601_s9 + $0x48] sm:$0xf0]  ;;  %v3235_v3 = vor.u32 %v3731_v59, %v3234_v57  ;;  %v3031_v57 = vor.u32 %v3678_v44, %v3028_v45  ;;  %v3386_v59 = vld [vmem:[%s5605_s13 + $0x60] sm:$0xf] }
 0x1ce   : > { %v3055_v12 = vor.u32 %v3684_v63, %v3052_v0  ;;  %v3785_v63 = vld [vmem:[%s5605_s13 + $0xe4] sm:$0xf0]  ;;  %v3019_v0 = vor.u32 %v3677_v48, %v3018_v47  ;;  %v3180_v44 = vld [vmem:[%s5603_s11 + $0xc8] sm:$0xf0]  ;;  %v3108_v47 = vld [vmem:[%s5603_s11 + $0x38] sm:$0xf0] }
 0x1cf   : > { %v1038_v9 = vpack.c.bf16 %v1035_v7, %v1035_v7  ;;  %v3299_v7 = vor.u32 %v3747_v62, %v3298_v60  ;;  %v3769_v60 = vld [vmem:[%s5605_s13 + $0x64] sm:$0xf0]  ;;  %v3450_v62 = vld [vmem:[%s5605_s13 + $0xe0] sm:$0xf] }
 0x1d0   : > { %1370 = vmatpush.bf16.msra.mxu3 %v3055_v12  ;;  %v3132_v12 = vld [vmem:[%s5603_s11 + $0x68] sm:$0xf0]  ;;  %v3451_v16 = vor.u32 %v3785_v63, %v3450_v62  ;;  %v3346_v63 = vld [vmem:[%s5605_s13 + $0x10] sm:$0xf] }
 0x1d1   : > { %1215 = vmatmul.bf16.vlgmr.msrb.gmra.mxu3 %v1038_v9  ;;  %1228 = vmatmul.bf16.vlgmr.msra.gmra.mxu0 %v1038_v9 }
 0x1d2   : > { %1241 = vmatmul.bf16.vlgmr.msra.gmra.mxu1 %v1038_v9  ;;  %1877 = vmatpush.bf16.msra.mxu0 %v3267_v8  ;;  %v3226_v8 = vld [vmem:[%s5605_s13 + $0x20] sm:$0xf]  ;;  %v3729_v9 = vld [vmem:[%s5605_s13 + $0x24] sm:$0xf0] }
 0x1d3   : > { %1890 = vmatpush.bf16.msra.mxu1 %v3331_v10  ;;  %v3290_v10 = vld [vmem:[%s5605_s13 + $0xa0] sm:$0xf] }
 0x1d4   : > { %v1036_v5 = vpop.f32.mrf.mxu2  ;;  %v3291_v23 = vor.u32 %v3745_v15, %v3290_v10  ;;  %1371 = vmatpush.bf16.msra.mxu3 %v3047_v27  ;;  %v3704_v10 = vld [vmem:[%s5603_s11 + $0x64] sm:$0xf]  ;;  %v4927_v15 = vpack.c.bf16 %v953_v50, %v953_v50  ;;  %v3124_v27 = vld [vmem:[%s5603_s11 + $0x58] sm:$0xf0]  ;;  %v3761_v50 = vld [vmem:[%s5605_s13 + $0x24] sm:$0xf0] }
 0x1d5   : > { %v3035_v5 = vor.u32 %v3681_v11, %v3034_v22  ;;  %v3783_v22 = vld [vmem:[%s5605_s13 + $0xd4] sm:$0xf0]  ;;  %v3135_v11 = vor.u32 %v3704_v10, %v3132_v12  ;;  %v3712_v12 = vld [vmem:[%s5603_s11 + $0xa4] sm:$0xf] }
 0x1d6   : > { %1878 = vmatpush.bf16.msra.mxu0 %v3259_v21  ;;  %v3227_v21 = vor.u32 %v3729_v9, %v3226_v8  ;;  %v4919_v8 = vpack.c.bf16 %v952_v49, %v952_v49  ;;  %v3387_v9 = vor.u32 %v3769_v60, %v3386_v59  ;;  %v3354_v49 = vld [vmem:[%s5605_s13 + $0x20] sm:$0xf] }
 0x1d7   : > { %1891 = vmatpush.bf16.msra.mxu1 %v3323_v26  ;;  %v3282_v26 = vld [vmem:[%s5605_s13 + $0x90] sm:$0xf]  ;;  %1359 = vmatpush.bf16.msra.mxu2 %v3035_v5  ;;  %v3355_v59 = vor.u32 %v3761_v50, %v3354_v49 }
 0x1d8   : > { %v3283_v38 = vor.u32 %v3743_v28, %v3282_v26  ;;  %1372 = vmatpush.bf16.msra.mxu3 %v3039_v41  ;;  %v3702_v26 = vld [vmem:[%s5603_s11 + $0x54] sm:$0xf]  ;;  %v3763_v41 = vld [vmem:[%s5605_s13 + $0x34] sm:$0xf0] }
 0x1d9   : > { %v3127_v34 = vor.u32 %v3702_v26, %v3124_v27  ;;  %v3156_v27 = vld [vmem:[%s5603_s11 + $0x98] sm:$0xf0] }
 0x1da   : > { %1879 = vmatpush.bf16.msra.mxu0 %v3251_v39  ;;  %v3274_v39 = vld [vmem:[%s5605_s13 + $0x80] sm:$0xf] }
 0x1db   : > { %1892 = vmatpush.bf16.msra.mxu1 %v3315_v43  ;;  %v3787_v43 = vld [vmem:[%s5605_s13 + $0xf4] sm:$0xf0]  ;;  %1360 = vmatpush.bf16.msra.mxu2 %v3027_v31  ;;  %v3716_v31 = vld [vmem:[%s5603_s11 + $0xc4] sm:$0xf] }
 0x1dc   : > { %1373 = vmatpush.bf16.msra.mxu3 %v3031_v57  ;;  %v3172_v57 = vld [vmem:[%s5603_s11 + $0xb8] sm:$0xf0] }
 0x1de   : > { %1880 = vmatpush.bf16.msra.mxu0 %v3243_v51  ;;  %v3275_v51 = vor.u32 %v3741_v40, %v3274_v39  ;;  %v3362_v40 = vld [vmem:[%s5605_s13 + $0x30] sm:$0xf] }
 0x1df   : > { %1893 = vmatpush.bf16.msra.mxu1 %v3307_v56  ;;  %v3459_v56 = vor.u32 %v3787_v43, %v3458_v25  ;;  %1361 = vmatpush.bf16.msra.mxu2 %v3019_v0  ;;  %v3779_v25 = vld [vmem:[%s5605_s13 + $0xb4] sm:$0xf0]  ;;  %v3363_v45 = vor.u32 %v3763_v41, %v3362_v40 }
 0x1e0   : > { %v3427_v48 = vor.u32 %v3779_v25, %v3426_v42  ;;  %v3759_v0 = vld [vmem:[%s5605_s13 + $0x14] sm:$0xf0]  ;;  %v3738_v25 = vld [vmem:[%s5605_s13 + $0x74] sm:$0xf] }
 0x1e1   : > { %1590 = vmatmul.bf16.vlgmr.msrb.gmra.mxu0 %v4789_v1 }
 0x1e2   : > { %1603 = vmatmul.bf16.vlgmr.msrb.gmra.mxu1 %v4806_v13  ;;  %1881 = vmatpush.bf16.msra.mxu0 %v3235_v3  ;;  %v3020_v3 = vld [vmem:[%s5601_s9 + $0x8] sm:$0xf0] }
 0x1e3   : > { %1894 = vmatpush.bf16.msra.mxu1 %v3299_v7  ;;  %v3204_v7 = vld [vmem:[%s5603_s11 + $0xf8] sm:$0xf0]  ;;  %v3023_v17 = vor.u32 %v3676_v2, %v3020_v3  ;;  %1608 = vmatpush.bf16.msrb.mxu2 %v3143_v4  ;;  %v3410_v2 = vld [vmem:[%s5605_s13 + $0x90] sm:$0xf]  ;;  %v3347_v3 = vor.u32 %v3759_v0, %v3346_v63  ;;  %v3775_v4 = vld [vmem:[%s5605_s13 + $0x94] sm:$0xf0] }
 0x1e4   : > { %v3207_v20 = vor.u32 %v3722_v6, %v3204_v7  ;;  %v3411_v6 = vor.u32 %v3775_v4, %v3410_v2  ;;  %v3696_v7 = vld [vmem:[%s5603_s11 + $0x24] sm:$0xf]  ;;  %v3734_v2 = vld [vmem:[%s5605_s13 + $0x54] sm:$0xf] }
 0x1e5   : > { %1374 = vmatpush.bf16.msra.mxu3 %v3023_v17  ;;  %v3750_v4 = vld [vmem:[%s5605_s13 + $0xd4] sm:$0xf] }
 0x1e6   : > { %1882 = vmatpush.bf16.msra.mxu0 %v3227_v21  ;;  %v3442_v21 = vld [vmem:[%s5605_s13 + $0xd0] sm:$0xf] }
 0x1e7   : > { %1895 = vmatpush.bf16.msra.mxu1 %v3291_v23  ;;  %v3720_v23 = vld [vmem:[%s5603_s11 + $0xe4] sm:$0xf]  ;;  %v3443_v28 = vor.u32 %v3783_v22, %v3442_v21  ;;  %1609 = vmatpush.bf16.msrb.mxu2 %v3135_v11  ;;  %v3339_v21 = vor.u32 %v3757_v19, %v3338_v18  ;;  %v3773_v22 = vld [vmem:[%s5605_s13 + $0x84] sm:$0xf0]  ;;  %v3244_v19 = vld [vmem:[%s5605_s13 + $0x48] sm:$0xf0] }
 0x1e8   : > { %v3199_v5 = vor.u32 %v3720_v23, %v3196_v24  ;;  %v3694_v23 = vld [vmem:[%s5603_s11 + $0x14] sm:$0xf]  ;;  %v3092_v24 = vld [vmem:[%s5603_s11 + $0x18] sm:$0xf0] }
 0x1e9   : > { %1621 = vmatpush.bf16.msrb.mxu3 %v3207_v20  ;;  %v3402_v20 = vld [vmem:[%s5605_s13 + $0x80] sm:$0xf]  ;;  %v3095_v26 = vor.u32 %v3694_v23, %v3092_v24  ;;  %v3730_v24 = vld [vmem:[%s5605_s13 + $0x34] sm:$0xf] }
 0x1ea   : > { %1883 = vmatpush.bf16.msra.mxu0 %v3219_v33  ;;  %v3781_v33 = vld [vmem:[%s5605_s13 + $0xc4] sm:$0xf0]  ;;  %v3403_v11 = vor.u32 %v3773_v22, %v3402_v20  ;;  %v3748_v20 = vld [vmem:[%s5605_s13 + $0xc4] sm:$0xf] }
 0x1eb   : > { %1896 = vmatpush.bf16.msra.mxu1 %v3283_v38  ;;  %v3700_v38 = vld [vmem:[%s5603_s11 + $0x44] sm:$0xf]  ;;  %v3435_v39 = vor.u32 %v3781_v33, %v3434_v32  ;;  %1610 = vmatpush.bf16.msrb.mxu2 %v3127_v34  ;;  %v3087_v32 = vor.u32 %v3692_v29, %v3084_v30  ;;  %v3148_v33 = vld [vmem:[%s5603_s11 + $0x88] sm:$0xf0] }
 0x1ec   : > { %v3119_v43 = vor.u32 %v3700_v38, %v3116_v55 }
 0x1ed   : > { %1622 = vmatpush.bf16.msrb.mxu3 %v3199_v5  ;;  %v3708_v5 = vld [vmem:[%s5603_s11 + $0x84] sm:$0xf] }
 0x1ee   : > { %1884 = vmatpush.bf16.msra.mxu0 %v3211_v46  ;;  %v3698_v46 = vld [vmem:[%s5603_s11 + $0x34] sm:$0xf]  ;;  %v3151_v34 = vor.u32 %v3708_v5, %v3148_v33  ;;  %v3728_v5 = vld [vmem:[%s5605_s13 + $0x24] sm:$0xf] }
 0x1ef   : > { %1897 = vmatpush.bf16.msra.mxu1 %v3275_v51  ;;  %v3183_v51 = vor.u32 %v3716_v31, %v3180_v44  ;;  %1611 = vmatpush.bf16.msrb.mxu2 %v3119_v43  ;;  %v3111_v54 = vor.u32 %v3698_v46, %v3108_v47  ;;  %v3268_v31 = vld [vmem:[%s5605_s13 + $0x78] sm:$0xf0]  ;;  %v3754_v44 = vld [vmem:[%s5605_s13 + $0xf4] sm:$0xf] }
 0x1f0   : > { %v3271_v50 = vor.u32 %v3738_v25, %v3268_v31  ;;  %v3724_v25 = vld [vmem:[%s5605_s13 + $0x4] sm:$0xf]  ;;  %v3212_v31 = vld [vmem:[%s5605_s13 + $0x8] sm:$0xf0] }
 0x1f1   : > { %1885 = vmatmul.bf16.vlgmr.msra.gmra.mxu0 %v4919_v8  ;;  %1623 = vmatpush.bf16.msrb.mxu3 %v3191_v58  ;;  %v1073_v58 = vperm.slane %v1071_v35, 0 }
 0x1f2   : > { %2172 = vmatpush.bf16.msrb.mxu0 %v3395_v52  ;;  %1898 = vmatmul.bf16.vlgmr.msra.gmra.mxu1 %v4927_v15  ;;  %v3418_v52 = vld [vmem:[%s5605_s13 + $0xa0] sm:$0xf] }
 0x1f3   : > { %2185 = vmatpush.bf16.msrb.mxu1 %v3459_v56  ;;  %v3714_v56 = vld [vmem:[%s5603_s11 + $0xb4] sm:$0xf]  ;;  %v3419_v60 = vor.u32 %v3777_v53, %v3418_v52  ;;  %1612 = vmatpush.bf16.msrb.mxu2 %v3111_v54  ;;  %v3736_v52 = vld [vmem:[%s5605_s13 + $0x64] sm:$0xf]  ;;  %v3260_v53 = vld [vmem:[%s5605_s13 + $0x68] sm:$0xf0] }
 0x1f4   : > { %v3175_v62 = vor.u32 %v3714_v56, %v3172_v57  ;;  %v3752_v57 = vld [vmem:[%s5605_s13 + $0xe4] sm:$0xf] }
 0x1f5   : > { %1624 = vmatpush.bf16.msrb.mxu3 %v3183_v51 }
 0x1f6   : > { %2173 = vmatpush.bf16.msrb.mxu0 %v3387_v9  ;;  %v3100_v9 = vld [vmem:[%s5603_s11 + $0x28] sm:$0xf0] }
 0x1f7   : > { %2186 = vmatpush.bf16.msrb.mxu1 %v3451_v16  ;;  %v3103_v10 = vor.u32 %v3696_v7, %v3100_v9  ;;  %v3164_v16 = vld [vmem:[%s5603_s11 + $0xa8] sm:$0xf0] }
 0x1f8   : > { %v3167_v17 = vor.u32 %v3712_v12, %v3164_v16  ;;  %v3732_v16 = vld [vmem:[%s5605_s13 + $0x44] sm:$0xf] }
 0x1f9   : > { %1625 = vmatpush.bf16.msrb.mxu3 %v3175_v62  ;;  %1613 = vmatpush.bf16.msrb.mxu2 %v3103_v10  ;;  %v3263_v62 = vor.u32 %v3736_v52, %v3260_v53  ;;  %v3460_v52 = vld [vmem:[%s5605_s13 + $0xf8] sm:$0xf0] }
 0x1fa   : > { %2174 = vmatpush.bf16.msrb.mxu0 %v3379_v61  ;;  %v3710_v61 = vld [vmem:[%s5603_s11 + $0x94] sm:$0xf] }
 0x1fb   : > { %2187 = vmatpush.bf16.msrb.mxu1 %v3443_v28  ;;  %v3159_v28 = vor.u32 %v3710_v61, %v3156_v27  ;;  %v3236_v61 = vld [vmem:[%s5605_s13 + $0x38] sm:$0xf0] }
 0x1fc   : > { %v3300_v27 = vld [vmem:[%s5605_s13 + $0xb8] sm:$0xf0]  ;;  %v3239_v29 = vor.u32 %v3730_v24, %v3236_v61  ;;  %v3801_v24 = vld [vmem:[%s5603_s11 + $0x64] sm:$0xf0]  ;;  %v3578_v61 = vld [vmem:[%s5603_s11 + $0xe0] sm:$0xf] }
 0x1fd   : > { %1626 = vmatpush.bf16.msrb.mxu3 %v3167_v17  ;;  %1614 = vmatpush.bf16.msrb.mxu2 %v3095_v26  ;;  %v3746_v26 = vld [vmem:[%s5605_s13 + $0xb4] sm:$0xf] }
 0x1fe   : > { %2175 = vmatpush.bf16.msrb.mxu0 %v3371_v37  ;;  %v1075_v37 = vperm.slane %v1071_v35, 2  ;;  %v3303_v30 = vor.u32 %v3746_v26, %v3300_v27  ;;  %v3292_v35 = vld [vmem:[%s5605_s13 + $0xa8] sm:$0xf0]  ;;  %v3817_v26 = vld [vmem:[%s5603_s11 + $0xe4] sm:$0xf0] }
 0x1ff   : > { %2188 = vmatpush.bf16.msrb.mxu1 %v3435_v39  ;;  %v3764_v27 = vld [vmem:[%s5605_s13 + $0x44] sm:$0xf] }
 0x201   : > { %1627 = vmatpush.bf16.msrb.mxu3 %v3159_v28  ;;  %1615 = vmatpush.bf16.msrb.mxu2 %v3087_v32  ;;  %v3228_v32 = vld [vmem:[%s5605_s13 + $0x28] sm:$0xf0] }
 0x202   : > { %2176 = vmatpush.bf16.msrb.mxu0 %v3363_v45  ;;  %v3332_v45 = vld [vmem:[%s5605_s13 + $0xf8] sm:$0xf0] }
 0x203   : > { %2189 = vmatpush.bf16.msrb.mxu1 %v3427_v48  ;;  %v3335_v51 = vor.u32 %v3754_v44, %v3332_v45 }
 0x205   : > { %1628 = vmatpush.bf16.msrb.mxu3 %v3151_v34  ;;  %v3744_v34 = vld [vmem:[%s5605_s13 + $0xa4] sm:$0xf] }
 0x206   : > { %2177 = vmatpush.bf16.msrb.mxu0 %v3355_v59  ;;  %v3324_v59 = vld [vmem:[%s5605_s13 + $0xe8] sm:$0xf0] }
 0x207   : > { %2190 = vmatpush.bf16.msrb.mxu1 %v3419_v60  ;;  %v5125_v60 = vld [vmem:[%s5604_s12] sm:$0x3]  ;;  %v3327_v63 = vor.u32 %v3752_v57, %v3324_v59 }
 0x208   : > { %v1418_v0 = vperm.slane %v5125_v60, 0 }
 0x20a   : > { %2178 = vmatpush.bf16.msrb.mxu0 %v3347_v3  ;;  %v3252_v3 = vld [vmem:[%s5605_s13 + $0x58] sm:$0xf0] }
 0x20b   : > { %2191 = vmatpush.bf16.msrb.mxu1 %v3411_v6  ;;  %v3316_v6 = vld [vmem:[%s5605_s13 + $0xd8] sm:$0xf0]  ;;  %v3255_v10 = vor.u32 %v3734_v2, %v3252_v3  ;;  %v3452_v2 = vld [vmem:[%s5605_s13 + $0xe8] sm:$0xf0] }
 0x20c   : > { %v3319_v12 = vor.u32 %v3750_v4, %v3316_v6  ;;  %v3522_v4 = vld [vmem:[%s5603_s11 + $0x70] sm:$0xf]  ;;  %v3803_v6 = vld [vmem:[%s5603_s11 + $0x74] sm:$0xf0] }
 0x20e   : > { %2179 = vmatpush.bf16.msrb.mxu0 %v3339_v21  ;;  %v3308_v21 = vld [vmem:[%s5605_s13 + $0xc8] sm:$0xf0] }
 0x20f   : > { %2192 = vmatpush.bf16.msrb.mxu1 %v3403_v11  ;;  %v3247_v11 = vor.u32 %v3732_v16, %v3244_v19  ;;  %v3311_v23 = vor.u32 %v3748_v20, %v3308_v21  ;;  %v3766_v16 = vld [vmem:[%s5605_s13 + $0x54] sm:$0xf]  ;;  %v3819_v19 = vld [vmem:[%s5603_s11 + $0xf4] sm:$0xf0]  ;;  %v3444_v21 = vld [vmem:[%s5605_s13 + $0xd8] sm:$0xf0] }
 0x210   : > { %v3782_v20 = vld [vmem:[%s5605_s13 + $0xd4] sm:$0xf] }
 0x24e   : > { %v1229_v38 = vpop.f32.mrf.mxu0 }
 0x24f   : > { %v1230_v55 = vadd.f32 %v1229_v38, %v1074_v36  ;;  %v1242_v39 = vpop.f32.mrf.mxu1  ;;  %v5181_v36 = vld [vmem:[%s5606_s14] sm:$0x3]  ;;  %v3295_v38 = vor.u32 %v3744_v34, %v3292_v35  ;;  %v3436_v34 = vld [vmem:[%s5605_s13 + $0xc8] sm:$0xf0]  ;;  %v3570_v35 = vld [vmem:[%s5603_s11 + $0xd0] sm:$0xf] }
 0x250   : > { %v1243_v40 = vadd.f32 %v1242_v39, %v1075_v37  ;;  %v3231_v37 = vor.u32 %v3728_v5, %v3228_v32  ;;  %v3726_v39 = vld [vmem:[%s5605_s13 + $0x14] sm:$0xf]  ;;  %v3780_v5 = vld [vmem:[%s5605_s13 + $0xc4] sm:$0xf]  ;;  %v3506_v32 = vld [vmem:[%s5603_s11 + $0x50] sm:$0xf] }
 0x251   : > { %v1246_v41 = vmax.f32 %v1230_v55, 0.0  ;;  %v1713_v55 = vperm.slane %v5181_v36, 0 }
 0x252   : > { %v1247_v42 = vmax.f32 %v1243_v40, 0.0  ;;  %v3220_v40 = vld [vmem:[%s5605_s13 + $0x18] sm:$0xf0] }
 0x253   : > { %v5092_v43 = vpack.c.bf16 %v1246_v41, %v1246_v41 }
 0x254   : > { %v5103_v46 = vpack.c.bf16 %v1247_v42, %v1247_v42  ;;  %v1216_v47 = vpop.f32.mrf.mxu3 }
 0x255   : > { %v1217_v48 = vadd.f32 %v1216_v47, %v1073_v58  ;;  %2180 = vmatmul.bf16.vlgmr.msrb.gmra.mxu0 %v5092_v43  ;;  %v3223_v58 = vor.u32 %v3726_v39, %v3220_v40  ;;  %v3740_v47 = vld [vmem:[%s5605_s13 + $0x84] sm:$0xf]  ;;  %v3498_v40 = vld [vmem:[%s5603_s11 + $0x40] sm:$0xf] }
 0x256   : > { %2193 = vmatmul.bf16.vlgmr.msrb.gmra.mxu1 %v5103_v46  ;;  %v1231_v49 = vpop.f32.mrf.mxu0 }
 0x257   : > { %1250 = vst [vmem:[%s5618_s28] sm:$0xff] %v1217_v48  ;;  %v1251_v54 = vpack.c.bf16 %v1217_v48, %v1217_v48  ;;  %v1244_v56 = vpop.f32.mrf.mxu1  ;;  %v3276_v48 = vld [vmem:[%s5605_s13 + $0x88] sm:$0xf0]  ;;  %v3770_v49 = vld [vmem:[%s5605_s13 + $0x74] sm:$0xf] }
 0x258   : > { %v3279_v56 = vor.u32 %v3740_v47, %v3276_v48 }
 0x259   : > { %1362 = vmatmul.bf16.vlgmr.msra.gmra.mxu2 %v1251_v54  ;;  %1375 = vmatmul.bf16.vlgmr.msra.gmra.mxu3 %v1251_v54  ;;  %v3215_v54 = vor.u32 %v3724_v25, %v3212_v31  ;;  %v3364_v25 = vld [vmem:[%s5605_s13 + $0x38] sm:$0xf0]  ;;  %v3778_v31 = vld [vmem:[%s5605_s13 + $0xb4] sm:$0xf] }
 0x25a   : > { %1903 = vmatpush.bf16.msra.mxu2 %v3271_v50  ;;  %1916 = vmatpush.bf16.msra.mxu3 %v3335_v51  ;;  %v3396_v50 = vld [vmem:[%s5605_s13 + $0x78] sm:$0xf0]  ;;  %v3786_v51 = vld [vmem:[%s5605_s13 + $0xf4] sm:$0xf] }
 0x25b   : > { %v3399_v57 = vor.u32 %v3770_v49, %v3396_v50  ;;  %v3463_v59 = vor.u32 %v3786_v51, %v3460_v52  ;;  %v3760_v50 = vld [vmem:[%s5605_s13 + $0x24] sm:$0xf]  ;;  %v3356_v51 = vld [vmem:[%s5605_s13 + $0x28] sm:$0xf0] }
 0x25c   : > { %v1218_v7 = vpop.f32.mrf.mxu3  ;;  %v3776_v52 = vld [vmem:[%s5605_s13 + $0xa4] sm:$0xf] }
 0x25d   : > { %v3586_v7 = vld [vmem:[%s5603_s11 + $0xf0] sm:$0xf] }
 0x25e   : > { %1904 = vmatpush.bf16.msra.mxu2 %v3263_v62  ;;  %1917 = vmatpush.bf16.msra.mxu3 %v3327_v63  ;;  %v1591_v9 = vpop.f32.mrf.mxu0  ;;  %v3768_v62 = vld [vmem:[%s5605_s13 + $0x64] sm:$0xf]  ;;  %v3388_v63 = vld [vmem:[%s5605_s13 + $0x68] sm:$0xf0] }
 0x25f   : > { %v1592_v17 = vadd.f32 %v1591_v9, %v1418_v0  ;;  %v1604_v18 = vpop.f32.mrf.mxu1  ;;  %v3784_v0 = vld [vmem:[%s5605_s13 + $0xe4] sm:$0xf] }
 0x261   : > { %v5152_v22 = vadd.f32 %v1604_v18, %v1592_v17  ;;  %v3380_v17 = vld [vmem:[%s5605_s13 + $0x58] sm:$0xf0]  ;;  %v3523_v18 = vor.u32 %v3803_v6, %v3522_v4  ;;  %v3756_v4 = vld [vmem:[%s5605_s13 + $0x4] sm:$0xf]  ;;  %v3340_v6 = vld [vmem:[%s5605_s13 + $0x8] sm:$0xf0] }
 0x262   : > { %1905 = vmatpush.bf16.msra.mxu2 %v3255_v10  ;;  %1918 = vmatpush.bf16.msra.mxu3 %v3319_v12  ;;  %v3391_v10 = vor.u32 %v3768_v62, %v3388_v63  ;;  %v3455_v12 = vor.u32 %v3784_v0, %v3452_v2  ;;  %v3348_v62 = vld [vmem:[%s5605_s13 + $0x18] sm:$0xf0]  ;;  %v3774_v63 = vld [vmem:[%s5605_s13 + $0x94] sm:$0xf] }
 0x263   : > { %2467 = vmatpush.bf16.msra.mxu0 %v3523_v18  ;;  %v3412_v0 = vld [vmem:[%s5605_s13 + $0x98] sm:$0xf0]  ;;  %v3343_v18 = vor.u32 %v3756_v4, %v3340_v6  ;;  %v3790_v4 = vld [vmem:[%s5603_s11 + $0x14] sm:$0xf] }
 0x266   : > { %1906 = vmatpush.bf16.msra.mxu2 %v3247_v11  ;;  %1919 = vmatpush.bf16.msra.mxu3 %v3311_v23  ;;  %v1593_v28 = vpop.f32.mrf.mxu0  ;;  %v3587_v11 = vor.u32 %v3819_v19, %v3586_v7  ;;  %v3514_v23 = vld [vmem:[%s5603_s11 + $0x60] sm:$0xf]  ;;  %v3772_v7 = vld [vmem:[%s5605_s13 + $0x84] sm:$0xf] }
 0x267   : > { %v1606_v33 = vpop.f32.mrf.mxu1  ;;  %v3579_v28 = vor.u32 %v3817_v26, %v3578_v61  ;;  %v3580_v61 = vld [vmem:[%s5603_s11 + $0xe8] sm:$0xf0] }
 0x268   : > { %2480 = vmatpush.bf16.msra.mxu1 %v3587_v11  ;;  %v3799_v33 = vld [vmem:[%s5603_s11 + $0x54] sm:$0xf0]  ;;  %v3800_v11 = vld [vmem:[%s5603_s11 + $0x64] sm:$0xf] }
 0x269   : > { %1616 = vmatmul.bf16.vlgmr.msrb.gmra.mxu2 %v4789_v1  ;;  %1629 = vmatmul.bf16.vlgmr.msrb.gmra.mxu3 %v4806_v13  ;;  %v3742_v1 = vld [vmem:[%s5605_s13 + $0x94] sm:$0xf]  ;;  %v3284_v13 = vld [vmem:[%s5605_s13 + $0x98] sm:$0xf0] }
 0x26a   : > { %1907 = vmatpush.bf16.msra.mxu2 %v3239_v29  ;;  %1920 = vmatpush.bf16.msra.mxu3 %v3303_v30  ;;  %v3287_v42 = vor.u32 %v3742_v1, %v3284_v13  ;;  %v3383_v29 = vor.u32 %v3766_v16, %v3380_v17  ;;  %v3447_v30 = vor.u32 %v3782_v20, %v3444_v21  ;;  %v3818_v16 = vld [vmem:[%s5603_s11 + $0xf4] sm:$0xf]  ;;  %v3588_v17 = vld [vmem:[%s5603_s11 + $0xf8] sm:$0xf0] }
 0x26b   : > { %v3439_v13 = vor.u32 %v3780_v5, %v3436_v34  ;;  %v3591_v21 = vor.u32 %v3818_v16, %v3588_v17  ;;  %v3812_v34 = vld [vmem:[%s5603_s11 + $0xc4] sm:$0xf]  ;;  %v3466_v17 = vld [vmem:[%s5603_s11] sm:$0xf] }
 0x26c   : > { %2481 = vmatpush.bf16.msra.mxu1 %v3579_v28  ;;  %v3814_v28 = vld [vmem:[%s5603_s11 + $0xd4] sm:$0xf] }
 0x26e   : > { %1908 = vmatpush.bf16.msra.mxu2 %v3231_v37  ;;  %1921 = vmatpush.bf16.msra.mxu3 %v3295_v38  ;;  %v1886_v41 = vpop.f32.mrf.mxu0  ;;  %v3815_v37 = vld [vmem:[%s5603_s11 + $0xd4] sm:$0xf0]  ;;  %v3762_v38 = vld [vmem:[%s5605_s13 + $0x34] sm:$0xf] }
 0x26f   : > { %v1887_v44 = vadd.f32 %v1886_v41, %v1713_v55  ;;  %v1899_v45 = vpop.f32.mrf.mxu1  ;;  %v3507_v55 = vor.u32 %v3799_v33, %v3506_v32  ;;  %v3571_v39 = vor.u32 %v3815_v37, %v3570_v35  ;;  %v3797_v41 = vld [vmem:[%s5603_s11 + $0x44] sm:$0xf0]  ;;  %v3367_v48 = vor.u32 %v3762_v38, %v3364_v25  ;;  %v3796_v32 = vld [vmem:[%s5603_s11 + $0x44] sm:$0xf]  ;;  %v3500_v33 = vld [vmem:[%s5603_s11 + $0x48] sm:$0xf0] }
 0x270   : > { %v3490_v37 = vld [vmem:[%s5603_s11 + $0x30] sm:$0xf]  ;;  %v3795_v38 = vld [vmem:[%s5603_s11 + $0x34] sm:$0xf0]  ;;  %v3556_v25 = vld [vmem:[%s5603_s11 + $0xb8] sm:$0xf0] }
 0x271   : > { %v5222_v53 = vadd.f32 %v1899_v45, %v1887_v44  ;;  %v3428_v44 = vld [vmem:[%s5605_s13 + $0xb8] sm:$0xf0]  ;;  %2482 = vmatpush.bf16.msra.mxu1 %v3571_v39  ;;  %v3499_v45 = vor.u32 %v3797_v41, %v3498_v40  ;;  %v3491_v39 = vor.u32 %v3795_v38, %v3490_v37  ;;  %v3811_v40 = vld [vmem:[%s5603_s11 + $0xb4] sm:$0xf0] }
 0x272   : > { %1909 = vmatpush.bf16.msra.mxu2 %v3223_v58  ;;  %1922 = vmatpush.bf16.msra.mxu3 %v3287_v42  ;;  %v3562_v58 = vld [vmem:[%s5603_s11 + $0xc0] sm:$0xf]  ;;  %v3813_v42 = vld [vmem:[%s5603_s11 + $0xc4] sm:$0xf0]  ;;  %v3431_v49 = vor.u32 %v3778_v31, %v3428_v44 }
 0x273   : > { %v3563_v47 = vor.u32 %v3813_v42, %v3562_v58  ;;  %v3810_v42 = vld [vmem:[%s5603_s11 + $0xb4] sm:$0xf]  ;;  %v3482_v44 = vld [vmem:[%s5603_s11 + $0x20] sm:$0xf] }
 0x274   : > { %v3559_v31 = vor.u32 %v3810_v42, %v3556_v25  ;;  %v1419_v25 = vperm.slane %v5125_v60, 1  ;;  %v1638_v60 = vsub.f32 %v5152_v22, %v4497_v14 }
 0x275   : > { %2483 = vmatpush.bf16.msra.mxu1 %v3563_v47  ;;  %v3546_v47 = vld [vmem:[%s5603_s11 + $0xa0] sm:$0xf] }
 0x276   : > { %1910 = vmatpush.bf16.msra.mxu2 %v3215_v54  ;;  %1923 = vmatpush.bf16.msra.mxu3 %v3279_v56  ;;  %v1888_v3 = vpop.f32.mrf.mxu0  ;;  %v3420_v54 = vld [vmem:[%s5605_s13 + $0xa8] sm:$0xf0]  ;;  %v3359_v56 = vor.u32 %v3760_v50, %v3356_v51  ;;  %v3792_v50 = vld [vmem:[%s5603_s11 + $0x24] sm:$0xf] }
 0x277   : > { %v1901_v9 = vpop.f32.mrf.mxu1  ;;  %v3415_v3 = vor.u32 %v3774_v63, %v3412_v0  ;;  %v3484_v51 = vld [vmem:[%s5603_s11 + $0x28] sm:$0xf0]  ;;  %v3791_v63 = vld [vmem:[%s5603_s11 + $0x14] sm:$0xf0]  ;;  %v3538_v0 = vld [vmem:[%s5603_s11 + $0x90] sm:$0xf] }
 0x278   : > { %v3404_v9 = vld [vmem:[%s5605_s13 + $0x88] sm:$0xf0] }
 0x279   : > { %1911 = vmatmul.bf16.vlgmr.msra.gmra.mxu2 %v4919_v8  ;;  %1924 = vmatmul.bf16.vlgmr.msra.gmra.mxu3 %v4927_v15  ;;  %v3372_v8 = vld [vmem:[%s5605_s13 + $0x48] sm:$0xf0]  ;;  %v3515_v15 = vor.u32 %v3801_v24, %v3514_v23  ;;  %v3407_v19 = vor.u32 %v3772_v7, %v3404_v9  ;;  %v3816_v24 = vld [vmem:[%s5603_s11 + $0xe4] sm:$0xf]  ;;  %v3476_v7 = vld [vmem:[%s5603_s11 + $0x18] sm:$0xf0] }
 0x27a   : > { %2198 = vmatpush.bf16.msrb.mxu2 %v3399_v57  ;;  %2211 = vmatpush.bf16.msrb.mxu3 %v3463_v59  ;;  %v3375_v1 = vor.u32 %v3764_v27, %v3372_v8  ;;  %v3423_v57 = vor.u32 %v3776_v52, %v3420_v54  ;;  %v3758_v59 = vld [vmem:[%s5605_s13 + $0x14] sm:$0xf]  ;;  %v3516_v23 = vld [vmem:[%s5603_s11 + $0x68] sm:$0xf0]  ;;  %v3583_v27 = vor.u32 %v3816_v24, %v3580_v61 }
 0x27b   : > { %2468 = vmatpush.bf16.msra.mxu0 %v3515_v15  ;;  %v3351_v2 = vor.u32 %v3758_v59, %v3348_v62  ;;  %v3519_v26 = vor.u32 %v3800_v11, %v3516_v23  ;;  %v3798_v8 = vld [vmem:[%s5603_s11 + $0x54] sm:$0xf]  ;;  %v3508_v15 = vld [vmem:[%s5603_s11 + $0x58] sm:$0xf0]  ;;  %v3487_v54 = vor.u32 %v3792_v50, %v3484_v51  ;;  %v3474_v62 = vld [vmem:[%s5603_s11 + $0x10] sm:$0xf] }
 0x27c   : > { %v3806_v9 = vld [vmem:[%s5603_s11 + $0x94] sm:$0xf]  ;;  %v3788_v11 = vld [vmem:[%s5603_s11 + $0x4] sm:$0xf]  ;;  %v3468_v23 = vld [vmem:[%s5603_s11 + $0x8] sm:$0xf0] }
 0x27d   : > { %v3471_v61 = vor.u32 %v3788_v11, %v3468_v23 }
 0x27e   : > { %2199 = vmatpush.bf16.msrb.mxu2 %v3391_v10  ;;  %2212 = vmatpush.bf16.msrb.mxu3 %v3455_v12  ;;  %v3802_v10 = vld [vmem:[%s5603_s11 + $0x74] sm:$0xf]  ;;  %v3524_v12 = vld [vmem:[%s5603_s11 + $0x78] sm:$0xf0] }
 0x27f   : > { %2469 = vmatpush.bf16.msra.mxu0 %v3507_v55  ;;  %v3527_v20 = vor.u32 %v3802_v10, %v3524_v12  ;;  %v3554_v55 = vld [vmem:[%s5603_s11 + $0xb0] sm:$0xf]  ;;  %v3479_v10 = vor.u32 %v3790_v4, %v3476_v7  ;;  %v3540_v12 = vld [vmem:[%s5603_s11 + $0x98] sm:$0xf0]  ;;  %v1670_v7 = vmul.f32 %v5152_v22, %v5152_v22 }
 0x280   : > { %v3555_v41 = vor.u32 %v3811_v40, %v3554_v55  ;;  %v3543_v16 = vor.u32 %v3806_v9, %v3540_v12 }
 0x282   : > { %2200 = vmatpush.bf16.msrb.mxu2 %v3383_v29  ;;  %2213 = vmatpush.bf16.msrb.mxu3 %v3447_v30  ;;  %v3572_v29 = vld [vmem:[%s5603_s11 + $0xd8] sm:$0xf0]  ;;  %v3511_v30 = vor.u32 %v3798_v8, %v3508_v15  ;;  %v5507_v15 = vld [vmem:[%s5606_s14] sm:$0x3] }
 0x283   : > { %2470 = vmatpush.bf16.msra.mxu0 %v3499_v45  ;;  %v3575_v5 = vor.u32 %v3814_v28, %v3572_v29  ;;  %2484 = vmatpush.bf16.msra.mxu1 %v3555_v41  ;;  %v3793_v45 = vld [vmem:[%s5603_s11 + $0x24] sm:$0xf0]  ;;  %v2008_v28 = vperm.slane %v5507_v15, 0 }
 0x286   : > { %2201 = vmatpush.bf16.msrb.mxu2 %v3375_v1  ;;  %2214 = vmatpush.bf16.msrb.mxu3 %v3439_v13  ;;  %v3794_v1 = vld [vmem:[%s5603_s11 + $0x34] sm:$0xf]  ;;  %v3492_v13 = vld [vmem:[%s5603_s11 + $0x38] sm:$0xf0] }
 0x287   : > { %v3495_v58 = vor.u32 %v3794_v1, %v3492_v13  ;;  %2471 = vmatpush.bf16.msra.mxu0 %v3491_v39 }
 0x28a   : > { %2202 = vmatpush.bf16.msrb.mxu2 %v3367_v48  ;;  %2215 = vmatpush.bf16.msrb.mxu3 %v3431_v49  ;;  %v3483_v48 = vor.u32 %v3793_v45, %v3482_v44  ;;  %v3809_v49 = vld [vmem:[%s5603_s11 + $0xa4] sm:$0xf0] }
 0x28b   : > { %v3547_v52 = vor.u32 %v3809_v49, %v3546_v47 }
 0x28c   : > { %2472 = vmatpush.bf16.msra.mxu0 %v3483_v48 }
 0x28d   : > { %2485 = vmatpush.bf16.msra.mxu1 %v3547_v52 }
 0x28e   : > { %2203 = vmatpush.bf16.msrb.mxu2 %v3359_v56  ;;  %2216 = vmatpush.bf16.msrb.mxu3 %v3423_v57  ;;  %v3808_v56 = vld [vmem:[%s5603_s11 + $0xa4] sm:$0xf]  ;;  %v3548_v57 = vld [vmem:[%s5603_s11 + $0xa8] sm:$0xf0] }
 0x28f   : > { %v3551_v59 = vor.u32 %v3808_v56, %v3548_v57 }
 0x292   : > { %2204 = vmatpush.bf16.msrb.mxu2 %v3351_v2  ;;  %2217 = vmatpush.bf16.msrb.mxu3 %v3415_v3  ;;  %v3475_v2 = vor.u32 %v3791_v63, %v3474_v62  ;;  %v3807_v3 = vld [vmem:[%s5603_s11 + $0x94] sm:$0xf0] }
 0x293   : > { %v3539_v6 = vor.u32 %v3807_v3, %v3538_v0 }
 0x294   : > { %2473 = vmatpush.bf16.msra.mxu0 %v3475_v2 }
 0x295   : > { %2486 = vmatpush.bf16.msra.mxu1 %v3539_v6  ;;  %v1639_v6 = vmul.f32 %v1638_v60, %v1638_v60 }
 0x296   : > { %2205 = vmatpush.bf16.msrb.mxu2 %v3343_v18  ;;  %2218 = vmatpush.bf16.msrb.mxu3 %v3407_v19  ;;  %v3789_v18 = vld [vmem:[%s5603_s11 + $0x4] sm:$0xf0]  ;;  %v3530_v19 = vld [vmem:[%s5603_s11 + $0x80] sm:$0xf] }
 0x299   : > { %2206 = vmatmul.bf16.vlgmr.msrb.gmra.mxu2 %v5092_v43  ;;  %2219 = vmatmul.bf16.vlgmr.msrb.gmra.mxu3 %v5103_v46  ;;  %v3564_v43 = vld [vmem:[%s5603_s11 + $0xc8] sm:$0xf0]  ;;  %v3503_v46 = vor.u32 %v3796_v32, %v3500_v33  ;;  %v1268_v33 = vld [vmem:[%s5602_s10] sm:$0x3] }
 0x29a   : > { %2493 = vmatpush.bf16.msra.mxu2 %v3527_v20  ;;  %2506 = vmatpush.bf16.msra.mxu3 %v3591_v21  ;;  %v3567_v35 = vor.u32 %v3812_v34, %v3564_v43  ;;  %v3467_v20 = vor.u32 %v3789_v18, %v3466_v17  ;;  %v3805_v21 = vld [vmem:[%s5603_s11 + $0x84] sm:$0xf0]  ;;  %v1270_v34 = vperm.slane %v1268_v33, 0  ;;  %v1271_v43 = vperm.slane %v1268_v33, 1 }
 0x29b   : > { %v3531_v24 = vor.u32 %v3805_v21, %v3530_v19 }
 0x29c   : > { %2474 = vmatpush.bf16.msra.mxu0 %v3467_v20 }
 0x29d   : > { %2487 = vmatpush.bf16.msra.mxu1 %v3531_v24 }
 0x29e   : > { %2494 = vmatpush.bf16.msra.mxu2 %v3519_v26  ;;  %2507 = vmatpush.bf16.msra.mxu3 %v3583_v27  ;;  %v3804_v26 = vld [vmem:[%s5603_s11 + $0x84] sm:$0xf]  ;;  %v3532_v27 = vld [vmem:[%s5603_s11 + $0x88] sm:$0xf0] }
 0x29f   : > { %v3535_v8 = vor.u32 %v3804_v26, %v3532_v27 }
 0x2a2   : > { %2495 = vmatpush.bf16.msra.mxu2 %v3511_v30  ;;  %2508 = vmatpush.bf16.msra.mxu3 %v3575_v5 }
 0x2a6   : > { %2496 = vmatpush.bf16.msra.mxu2 %v3503_v46  ;;  %2509 = vmatpush.bf16.msra.mxu3 %v3567_v35 }
 0x2aa   : > { %2497 = vmatpush.bf16.msra.mxu2 %v3495_v58  ;;  %2510 = vmatpush.bf16.msra.mxu3 %v3559_v31 }
 0x2ae   : > { %2498 = vmatpush.bf16.msra.mxu2 %v3487_v54  ;;  %2511 = vmatpush.bf16.msra.mxu3 %v3551_v59  ;;  %v1714_v54 = vperm.slane %v5181_v36, 1 }
 0x2b2   : > { %2499 = vmatpush.bf16.msra.mxu2 %v3479_v10  ;;  %2512 = vmatpush.bf16.msra.mxu3 %v3543_v16 }
 0x2b6   : > { %2500 = vmatpush.bf16.msra.mxu2 %v3471_v61  ;;  %2513 = vmatpush.bf16.msra.mxu3 %v3535_v8 }
 0x2d2   : > { %v2181_v29 = vpop.f32.mrf.mxu0 }
 0x2d3   : > { %v2182_v30 = vadd.f32 %v2181_v29, %v2008_v28  ;;  %v2194_v5 = vpop.f32.mrf.mxu1 }
 0x2d5   : > { %v5510_v32 = vadd.f32 %v2194_v5, %v2182_v30 }
 0x2da   : > { %v2183_v46 = vpop.f32.mrf.mxu0 }
 0x2db   : > { %v2196_v35 = vpop.f32.mrf.mxu1 }
 0x2dc   : > { %v1363_v37 = vpop.f32.mrf.mxu2  ;;  %v1376_v38 = vpop.f32.mrf.mxu3 }
 0x2dd   : > { %v1364_v55 = vadd.f32 %v1363_v37, %v1270_v34  ;;  %v1377_v39 = vadd.f32 %v1376_v38, %v1271_v43 }
 0x2df   : > { %v1380_v40 = vmax.f32 %v1364_v55, 0.0  ;;  %v1381_v1 = vmax.f32 %v1377_v39, 0.0  ;;  %v1933_v55 = vsub.f32 %v5222_v53, %v4497_v14 }
 0x2e1   : > { %v1382_v13 = vpack.c.bf16 %v1380_v40, %v1380_v40  ;;  %v1383_v41 = vpack.c.bf16 %v1381_v1, %v1381_v1 }
 0x2e3   : > { %2475 = vmatmul.bf16.vlgmr.msra.gmra.mxu0 %v1382_v13  ;;  %2488 = vmatmul.bf16.vlgmr.msra.gmra.mxu1 %v1383_v41 }
 0x2e4   : > { %2501 = vmatmul.bf16.vlgmr.msra.gmra.mxu2 %v1382_v13  ;;  %2514 = vmatmul.bf16.vlgmr.msra.gmra.mxu3 %v1383_v41  ;;  %v1365_v58 = vpop.f32.mrf.mxu2  ;;  %v1378_v42 = vpop.f32.mrf.mxu3 }
 0x2ec   : > { %v1617_v31 = vpop.f32.mrf.mxu2  ;;  %v1630_v44 = vpop.f32.mrf.mxu3 }
 0x2ed   : > { %v1618_v45 = vadd.f32 %v1617_v31, %v1419_v25 }
 0x2ef   : > { %v1631_v47 = vadd.f32 %v1630_v44, %v1618_v45 }
 0x2f1   : > { %3861 = vtanh.f32 %v1631_v47 }
 0x2f4   : > { %v1619_v48 = vpop.f32.mrf.mxu2  ;;  %v1632_v49 = vpop.f32.mrf.mxu3 }
 0x2f7   : > { %v3862_v50 = vpop.eup %3861 }
 0x2f8   : > { %v1635_v51 = vsub.f32 0.0, %v3862_v50  ;;  %v1648_v52 = vrot.slane %v3862_v50, 4 }
 0x2fa   : > { %v1636_v56 = vmul.f32 1.442695, %v1635_v51  ;;  %v1649_v57 = vadd.f32 %v3862_v50, %v1648_v52 }
 0x2fc   : > { %3863 = vpow2.f32 %v1636_v56  ;;  %v1650_v59 = vrot.slane %v1649_v57, 2  ;;  %v1912_v62 = vpop.f32.mrf.mxu2  ;;  %v1925_v63 = vpop.f32.mrf.mxu3 }
 0x2fd   : > { %v1913_v0 = vadd.f32 %v1912_v62, %v1714_v54 }
 0x2fe   : > { %v1651_v2 = vadd.f32 %v1650_v59, %v1649_v57 }
 0x2ff   : > { %v1926_v3 = vadd.f32 %v1925_v63, %v1913_v0 }
 0x300   : > { %v1652_v4 = vrot.slane %v1651_v2, 1 }
 0x301   : > { %3865 = vtanh.f32 %v1926_v3 }
 0x302   : > { %v3864_v36 = vpop.eup %3863  ;;  %v1653_v9 = vadd.f32 %v1652_v4, %v1651_v2 }
 0x303   : > { %v1640_v10 = vmul.f32 %v3864_v36, %v1639_v6  ;;  %v1655_v12 = vrot.slane %v3864_v36, 4  ;;  %v1662_v16 = vmul.f32 %v3864_v36, %v5152_v22  ;;  %v1671_v17 = vmul.f32 %v3864_v36, %v1670_v7 }
 0x304   : > { %1654 = vst [vmem:[%s4409_s17 + $0x1] sm:$0x1] %v1653_v9  ;;  %v1914_v18 = vpop.f32.mrf.mxu2  ;;  %v1927_v19 = vpop.f32.mrf.mxu3 }
 0x305   : > { %v1641_v20 = vrot.slane %v1640_v10, 4  ;;  %v1656_v21 = vadd.f32 %v3864_v36, %v1655_v12  ;;  %v1663_v11 = vrot.slane %v1662_v16, 4  ;;  %v1672_v23 = vrot.slane %v1671_v17, 4 }
 0x307   : > { %v3866_v24 = vpop.eup %3865  ;;  %v1642_v61 = vadd.f32 %v1641_v20, %v1640_v10  ;;  %v1657_v26 = vrot.slane %v1656_v21, 2  ;;  %v1664_v27 = vadd.f32 %v1663_v11, %v1662_v16  ;;  %v1673_v8 = vadd.f32 %v1672_v23, %v1671_v17 }
 0x308   : > { %v1930_v28 = vsub.f32 0.0, %v3866_v24  ;;  %v1943_v29 = vrot.slane %v3866_v24, 4 }
 0x309   : > { %v1643_v30 = vrot.slane %v1642_v61, 2  ;;  %v1658_v5 = vadd.f32 %v1657_v26, %v1656_v21  ;;  %v1665_v22 = vrot.slane %v1664_v27, 2  ;;  %v1674_v33 = vrot.slane %v1673_v8, 2 }
 0x30a   : > { %v1931_v34 = vmul.f32 1.442695, %v1930_v28  ;;  %v1944_v43 = vadd.f32 %v3866_v24, %v1943_v29 }
 0x30b   : > { %v1644_v46 = vadd.f32 %v1643_v30, %v1642_v61  ;;  %v1659_v35 = vrot.slane %v1658_v5, 1  ;;  %v1666_v37 = vadd.f32 %v1665_v22, %v1664_v27  ;;  %v1675_v38 = vadd.f32 %v1674_v33, %v1673_v8 }
 0x30c   : > { %3867 = vpow2.f32 %v1931_v34  ;;  %v1945_v39 = vrot.slane %v1944_v43, 2 }
 0x30d   : > { %v1645_v40 = vrot.slane %v1644_v46, 1  ;;  %v1660_v1 = vadd.f32 %v1659_v35, %v1658_v5  ;;  %v1667_v13 = vrot.slane %v1666_v37, 1  ;;  %v1676_v41 = vrot.slane %v1675_v38, 1 }
 0x30e   : > { %v1946_v58 = vadd.f32 %v1945_v39, %v1944_v43 }
 0x30f   : > { %v1646_v42 = vadd.f32 %v1645_v40, %v1644_v46  ;;  %1661 = vst [vmem:[%s4409_s17 + $0x2] sm:$0x1] %v1660_v1  ;;  %v1668_v25 = vadd.f32 %v1667_v13, %v1666_v37  ;;  %v1677_v31 = vadd.f32 %v1676_v41, %v1675_v38 }
 0x310   : > { %3904 = shalt.err (!%p3901_p4)
}
 0x311   : > { %3820 = dma.vmem_to_hbm [thread:$0]  (%p4065_p5), %s2599_s19, 128, %s2601_s0, %s2581_s26   ;;  %v1947_v44 = vrot.slane %v1946_v58, 1  ;;  %v1934_v45 = vmul.f32 %v1933_v55, %v1933_v55  ;;  %v1965_v47 = vmul.f32 %v5222_v53, %v5222_v53  ;;  %1647 = vst [vmem:[%s4409_s17] sm:$0x1] %v1646_v42  ;;  %v2009_v63 = vperm.slane %v5507_v15, 1 }
 0x312   : > { %v3868_v48 = vpop.eup %3867  ;;  %1669 = vst [vmem:[%s4409_s17 + $0x3] sm:$0x1] %v1668_v25  ;;  %v2228_v33 = vsub.f32 %v5510_v32, %v4497_v14  ;;  %v2260_v35 = vmul.f32 %v5510_v32, %v5510_v32 }
 0x313   : > { %v1948_v49 = vadd.f32 %v1947_v44, %v1946_v58  ;;  %1678 = vst [vmem:[%s4409_s17 + $0x4] sm:$0x1] %v1677_v31  ;;  %v1935_v50 = vmul.f32 %v3868_v48, %v1934_v45  ;;  %v1950_v51 = vrot.slane %v3868_v48, 4  ;;  %v1957_v52 = vmul.f32 %v3868_v48, %v5222_v53 }
 0x314   : > { %v1966_v54 = vmul.f32 %v3868_v48, %v1965_v47  ;;  %v2229_v46 = vmul.f32 %v2228_v33, %v2228_v33 }
 0x315   : > { %1949 = vst [vmem:[%s4409_s17 + $0x6] sm:$0x1] %v1948_v49  ;;  %v1936_v56 = vrot.slane %v1935_v50, 4  ;;  %v1951_v57 = vadd.f32 %v3868_v48, %v1950_v51  ;;  %v1958_v59 = vrot.slane %v1957_v52, 4 }
 0x316   : > { %v1967_v62 = vrot.slane %v1966_v54, 4 }
 0x317   : > { %v1937_v60 = vadd.f32 %v1936_v56, %v1935_v50  ;;  %v1952_v0 = vrot.slane %v1951_v57, 2  ;;  %v1959_v2 = vadd.f32 %v1958_v59, %v1957_v52 }
 0x318   : > { %v1968_v3 = vadd.f32 %v1967_v62, %v1966_v54 }
 0x319   : > { %v1938_v4 = vrot.slane %v1937_v60, 2  ;;  %v1953_v6 = vadd.f32 %v1952_v0, %v1951_v57  ;;  %v1960_v7 = vrot.slane %v1959_v2, 2 }
 0x31a   : > { %v1969_v36 = vrot.slane %v1968_v3, 2 }
 0x31b   : > { %v1939_v12 = vadd.f32 %v1938_v4, %v1937_v60  ;;  %v1954_v16 = vrot.slane %v1953_v6, 1  ;;  %v1961_v17 = vadd.f32 %v1960_v7, %v1959_v2  ;;  %v2301_v4 = vld [vmem:[%s5604_s12] sm:$0x3] }
 0x31c   : > { %v2207_v9 = vpop.f32.mrf.mxu2  ;;  %v2220_v10 = vpop.f32.mrf.mxu3  ;;  %v1970_v18 = vadd.f32 %v1969_v36, %v1968_v3 }
 0x31d   : > { %v2208_v53 = vadd.f32 %v2207_v9, %v2009_v63  ;;  %v1940_v19 = vrot.slane %v1939_v12, 1  ;;  %v1955_v20 = vadd.f32 %v1954_v16, %v1953_v6  ;;  %v1962_v21 = vrot.slane %v1961_v17, 1 }
 0x31e   : > { %v1971_v11 = vrot.slane %v1970_v18, 1  ;;  %v2304_v6 = vperm.slane %v2301_v4, 1  ;;  %v2303_v16 = vperm.slane %v2301_v4, 0 }
 0x31f   : > { %v2221_v15 = vadd.f32 %v2220_v10, %v2208_v53  ;;  %v1941_v23 = vadd.f32 %v1940_v19, %v1939_v12  ;;  %1956 = vst [vmem:[%s4409_s17 + $0x7] sm:$0x1] %v1955_v20  ;;  %v1963_v24 = vadd.f32 %v1962_v21, %v1961_v17 }
 0x320   : > { %v1972_v61 = vadd.f32 %v1971_v11, %v1970_v18 }
 0x321   : > { %3869 = vtanh.f32 %v2221_v15  ;;  %1942 = vst [vmem:[%s4409_s17 + $0x5] sm:$0x1] %v1941_v23 }
 0x322   : > { %1964 = vst [vmem:[%s4409_s17 + $0x8] sm:$0x1] %v1963_v24 }
 0x323   : > { %1973 = vst [vmem:[%s4409_s17 + $0x9] sm:$0x1] %v1972_v61 }
 0x324   : > { %v2209_v26 = vpop.f32.mrf.mxu2  ;;  %v2222_v27 = vpop.f32.mrf.mxu3 }
 0x327   : > { %v3870_v8 = vpop.eup %3869 }
 0x328   : > { %v2225_v28 = vsub.f32 0.0, %v3870_v8  ;;  %v2238_v29 = vrot.slane %v3870_v8, 4 }
 0x32a   : > { %v2226_v30 = vmul.f32 1.442695, %v2225_v28  ;;  %v2239_v5 = vadd.f32 %v3870_v8, %v2238_v29 }
 0x32c   : > { %3871 = vpow2.f32 %v2226_v30  ;;  %v2240_v22 = vrot.slane %v2239_v5, 2 }
 0x32e   : > { %v2241_v34 = vadd.f32 %v2240_v22, %v2239_v5 }
 0x330   : > { %v2242_v43 = vrot.slane %v2241_v34, 1 }
 0x332   : > { %v3872_v37 = vpop.eup %3871  ;;  %v2243_v38 = vadd.f32 %v2242_v43, %v2241_v34 }
 0x333   : > { %v2230_v55 = vmul.f32 %v3872_v37, %v2229_v46  ;;  %v2245_v39 = vrot.slane %v3872_v37, 4  ;;  %v2252_v40 = vmul.f32 %v3872_v37, %v5510_v32  ;;  %v2261_v1 = vmul.f32 %v3872_v37, %v2260_v35 }
 0x334   : > { %2244 = vst [vmem:[%s4409_s17 + $0xb] sm:$0x1] %v2243_v38 }
 0x335   : > { %v2231_v13 = vrot.slane %v2230_v55, 4  ;;  %v2246_v41 = vadd.f32 %v3872_v37, %v2245_v39  ;;  %v2253_v58 = vrot.slane %v2252_v40, 4  ;;  %v2262_v42 = vrot.slane %v2261_v1, 4 }
 0x337   : > { %v2232_v25 = vadd.f32 %v2231_v13, %v2230_v55  ;;  %v2247_v31 = vrot.slane %v2246_v41, 2  ;;  %v2254_v44 = vadd.f32 %v2253_v58, %v2252_v40  ;;  %v2263_v45 = vadd.f32 %v2262_v42, %v2261_v1 }
 0x339   : > { %v2233_v47 = vrot.slane %v2232_v25, 2  ;;  %v2248_v48 = vadd.f32 %v2247_v31, %v2246_v41  ;;  %v2255_v49 = vrot.slane %v2254_v44, 2  ;;  %v2264_v50 = vrot.slane %v2263_v45, 2 }
 0x33b   : > { %v2234_v51 = vadd.f32 %v2233_v47, %v2232_v25  ;;  %v2249_v32 = vrot.slane %v2248_v48, 1  ;;  %v2256_v52 = vadd.f32 %v2255_v49, %v2254_v44  ;;  %v2265_v54 = vadd.f32 %v2264_v50, %v2263_v45 }
 0x33d   : > { %v2235_v56 = vrot.slane %v2234_v51, 1  ;;  %v2250_v57 = vadd.f32 %v2249_v32, %v2248_v48  ;;  %v2257_v59 = vrot.slane %v2256_v52, 1  ;;  %v2266_v62 = vrot.slane %v2265_v54, 1 }
 0x33f   : > { %v2236_v63 = vadd.f32 %v2235_v56, %v2234_v51  ;;  %2251 = vst [vmem:[%s4409_s17 + $0xc] sm:$0x1] %v2250_v57  ;;  %v2258_v60 = vadd.f32 %v2257_v59, %v2256_v52  ;;  %v2267_v0 = vadd.f32 %v2266_v62, %v2265_v54 }
 0x341   : > { %2237 = vst [vmem:[%s4409_s17 + $0xa] sm:$0x1] %v2236_v63 }
 0x342   : > { %2259 = vst [vmem:[%s4409_s17 + $0xd] sm:$0x1] %v2258_v60 }
 0x343   : > { %2268 = vst [vmem:[%s4409_s17 + $0xe] sm:$0x1] %v2267_v0 }
 0x360   : > { %v2476_v2 = vpop.f32.mrf.mxu0  ;;  %v2489_v3 = vpop.f32.mrf.mxu1 }
 0x361   : > { %v2477_v15 = vadd.f32 %v2476_v2, %v2303_v16 }
 0x363   : > { %v2490_v11 = vadd.f32 %v2489_v3, %v2477_v15 }
 0x365   : > { %v2523_v26 = vsub.f32 %v2490_v11, %v4497_v14  ;;  %v2555_v29 = vmul.f32 %v2490_v11, %v2490_v11 }
 0x367   : > { %v2502_v7 = vpop.f32.mrf.mxu2  ;;  %v2515_v36 = vpop.f32.mrf.mxu3  ;;  %v2524_v28 = vmul.f32 %v2523_v26, %v2523_v26 }
 0x368   : > { %v2503_v9 = vadd.f32 %v2502_v7, %v2304_v6  ;;  %v2478_v10 = vpop.f32.mrf.mxu0  ;;  %v2491_v53 = vpop.f32.mrf.mxu1 }
 0x36a   : > { %v2516_v12 = vadd.f32 %v2515_v36, %v2503_v9 }
 0x36c   : > { %3873 = vtanh.f32 %v2516_v12 }
 0x36f   : > { %v2504_v17 = vpop.f32.mrf.mxu2  ;;  %v2517_v18 = vpop.f32.mrf.mxu3 }
 0x372   : > { %v3874_v19 = vpop.eup %3873 }
 0x373   : > { %v2520_v20 = vsub.f32 0.0, %v3874_v19  ;;  %v2533_v21 = vrot.slane %v3874_v19, 4 }
 0x375   : > { %v2521_v23 = vmul.f32 1.442695, %v2520_v20  ;;  %v2534_v24 = vadd.f32 %v3874_v19, %v2533_v21 }
 0x377   : > { %3875 = vpow2.f32 %v2521_v23  ;;  %v2535_v61 = vrot.slane %v2534_v24, 2 }
 0x379   : > { %v2536_v27 = vadd.f32 %v2535_v61, %v2534_v24 }
 0x37b   : > { %v2537_v8 = vrot.slane %v2536_v27, 1 }
 0x37d   : > { %v3876_v30 = vpop.eup %3875  ;;  %v2538_v5 = vadd.f32 %v2537_v8, %v2536_v27 }
 0x37e   : > { %v2525_v22 = vmul.f32 %v3876_v30, %v2524_v28  ;;  %v2540_v33 = vrot.slane %v3876_v30, 4  ;;  %v2547_v34 = vmul.f32 %v3876_v30, %v2490_v11  ;;  %v2556_v43 = vmul.f32 %v3876_v30, %v2555_v29 }
 0x37f   : > { %2539 = vst [vmem:[%s4409_s17 + $0x10] sm:$0x1] %v2538_v5 }
 0x380   : > { %v2526_v46 = vrot.slane %v2525_v22, 4  ;;  %v2541_v35 = vadd.f32 %v3876_v30, %v2540_v33  ;;  %v2548_v37 = vrot.slane %v2547_v34, 4  ;;  %v2557_v38 = vrot.slane %v2556_v43, 4 }
 0x382   : > { %v2527_v55 = vadd.f32 %v2526_v46, %v2525_v22  ;;  %v2542_v39 = vrot.slane %v2541_v35, 2  ;;  %v2549_v40 = vadd.f32 %v2548_v37, %v2547_v34  ;;  %v2558_v14 = vadd.f32 %v2557_v38, %v2556_v43 }
 0x384   : > { %v2528_v1 = vrot.slane %v2527_v55, 2  ;;  %v2543_v13 = vadd.f32 %v2542_v39, %v2541_v35  ;;  %v2550_v41 = vrot.slane %v2549_v40, 2  ;;  %v2559_v58 = vrot.slane %v2558_v14, 2 }
 0x386   : > { %v2529_v42 = vadd.f32 %v2528_v1, %v2527_v55  ;;  %v2544_v25 = vrot.slane %v2543_v13, 1  ;;  %v2551_v31 = vadd.f32 %v2550_v41, %v2549_v40  ;;  %v2560_v44 = vadd.f32 %v2559_v58, %v2558_v14 }
 0x388   : > { %v2530_v45 = vrot.slane %v2529_v42, 1  ;;  %v2545_v47 = vadd.f32 %v2544_v25, %v2543_v13  ;;  %v2552_v48 = vrot.slane %v2551_v31, 1  ;;  %v2561_v49 = vrot.slane %v2560_v44, 1 }
 0x38a   : > { %v2531_v50 = vadd.f32 %v2530_v45, %v2529_v42  ;;  %2546 = vst [vmem:[%s4409_s17 + $0x11] sm:$0x1] %v2545_v47  ;;  %v2553_v51 = vadd.f32 %v2552_v48, %v2551_v31  ;;  %v2562_v32 = vadd.f32 %v2561_v49, %v2560_v44 }
 0x38c   : > { %2532 = vst [vmem:[%s4409_s17 + $0xf] sm:$0x1] %v2531_v50 }
 0x38d   : > { %2554 = vst [vmem:[%s4409_s17 + $0x12] sm:$0x1] %v2553_v51 }
 0x38e   : > { %2563 = vst [vmem:[%s4409_s17 + $0x13] sm:$0x1] %v2562_v32 }
 0x38f PF: > { %s5635_s19 = sld [smem:[#allocation7_spill]] }
 0x390   : > { %s5636_s0 = sld [smem:[#allocation5_spill]] }
 0x395   : > { %p3826_p5 = scmp.ge.s32.totalorder %s5635_s19, 2 }
 0x396   : > { %s2616_s30 = sand.u32 1, %s5636_s0  }
 0x397   : > { %p3823_p7 = pnand %p3826_p5, %p4069_p6  ;;  %s2617_s26 = scalar_lea.sflag [#allocation3], %s2616_s30 }
 0x399   : > { %p3824_p8 = pneg %p3823_p7 }
 0x39b   : > { %3922 = dma.done.wait (%p3824_p8), %s2617_s26, 128  }
 0x39c   : > { %3924 = vsyncadd (%p3824_p8), %s2617_s26, 4294967168  ;;  %s5638_s24 = sld [smem:[#allocation8_spill]]  ;;  %s5641_s21 = smov %s3931_s22 }
 0x39d   : > { %s5639_s23 = sld [smem:[#allocation6_spill]] }
 0x39e   : > { %s5640_s1 = sld [smem:[#allocation9_spill]] }
 0x3a2   : > { %p27_p9 = scmp.ge.s32.totalorder %s5638_s24, 4  }
 0x3a3   : > { %s5642_s22 = smov %s5639_s23 }
 0x3a4   : > { %s5643_s23 = smov %s5640_s1  ;;  %29 = sbr.rel (!%p27_p9) target bundleno = 6 (0x6), region = 127 }
 0x3a9   :  { %2631 = vsyncpa [#allocation3], 1 }
 0x3aa   :  { %2633 = vsyncpa [#allocation3 + $0x1], 1 }

</bundles_post_ra>
